<compile_context>
chip_gen: v5e
topology: v5e:2x2
jax: 0.10.0
libtpu: 0.0.40
codegen_flags: <defaults>
</compile_context>

<pallas_src>
import functools

import numpy as np
import jax
import jax.numpy as jnp
from jax import lax
from jax.experimental import pallas as pl
from jax.experimental.pallas import tpu as pltpu


def _sigmoid(x):
    # sigmoid(x) = 0.5 * (tanh(0.5 x) + 1): EUP tanh, numerically stable, no divide.
    return 0.5 * (jnp.tanh(0.5 * x) + 1.0)


def rs_matching_kernel(chunk_any_ref, fetch_ref, step_any_ref,   # SMEM scalar prefetch
                       seq_ref, mask_ref,                        # (Tb, Ts, D), (1, Tb, Ts)
                       wx_ref, wh_ref, bx_ref, bh_ref,           # (D,3D), (D,3D), (1,3D), (1,3D)
                       wc_ref, bc_ref,                           # (D,NL), (1,NL)
                       out_ref,                                  # (Tb, NL)
                       h_ref,                                    # VMEM scratch (Tb, D) — GRU carry
                       *, ts, d):
    del fetch_ref  # only consumed by the seq index_map (DMA skip for empty chunks)
    j = pl.program_id(1)          # S-chunk index (sequential / "arbitrary")
    nj = pl.num_programs(1)
    tb = h_ref.shape[0]
    g3 = 3 * d

    @pl.when(j == 0)
    def _():
        h_ref[...] = jnp.zeros_like(h_ref)

    # ---- whole-chunk skip: chunks with no sot anywhere do zero compute ------
    @pl.when(chunk_any_ref[j] != 0)
    def _():
        # hoisted input projection: one wide matmul for the whole chunk
        x2 = seq_ref[...].reshape(tb * ts, d)                              # (Tb*Ts, D)
        xp = jnp.dot(x2, wx_ref[...], preferred_element_type=jnp.float32) + bx_ref[...]
        xp = xp.reshape(tb, ts, g3)                                        # (Tb, Ts, 3D)

        m_all = mask_ref[...].reshape(tb, ts)                              # (Tb, Ts) lane-dense
        wh = wh_ref[...]
        bh = bh_ref[...]

        # recurrence: static (unrolled) loop over the chunk
        for s in range(ts):
            @pl.when(step_any_ref[j * ts + s] != 0)   # skip timesteps with no sot anywhere
            def _(s=s):
                h = h_ref[...]                                                 # (Tb, D)
                hp = jnp.dot(h, wh, preferred_element_type=jnp.float32) + bh   # (Tb, 3D)
                xs = xp[:, s, :]                                               # (Tb, 3D)
                r = _sigmoid(xs[:, 0:d] + hp[:, 0:d])
                z = _sigmoid(xs[:, d:2 * d] + hp[:, d:2 * d])
                n = jnp.tanh(xs[:, 2 * d:3 * d] + r * hp[:, 2 * d:3 * d])
                h_new = (1.0 - z) * n + z * h
                m = m_all[:, s:s + 1]                                          # (Tb, 1)
                h_ref[...] = m * h_new + (1.0 - m) * h                         # advance only at sot

    # ---- classifier + softmax, written once at the last chunk ---------------
    @pl.when(j == nj - 1)
    def _():
        h = h_ref[...]                        # match_vec (dropout = identity at inference)
        logits = jnp.dot(h, wc_ref[...], preferred_element_type=jnp.float32) + bc_ref[...]
        mx = jnp.max(logits, axis=-1, keepdims=True)
        e = jnp.exp(logits - mx)
        out_ref[...] = (e / jnp.sum(e, axis=-1, keepdims=True)).astype(out_ref.dtype)


def rsmatching_forward(sequence_output, sot_positions, params, *, ts=None, tb=None):
    """sequence_output: (B, S, D) f32, sot_positions: (B, S) int. Returns softmax probs (B, NL)."""
    B, S, D = sequence_output.shape
    NL = params["wc"].shape[1]
    G3 = 3 * D

    if ts is None:                       # S-chunk streamed per grid step (bounded unroll)
        ts = S if S <= 256 else 256
    if tb is None:                       # batch block (parallel axis; >=8 or full B)
        tb = B
    assert S % ts == 0 and (ts == S or ts % 8 == 0), "ts must divide S and be 8-aligned"
    assert B % tb == 0 and (tb == B or tb % 8 == 0), "tb must divide B and be 8-aligned"

    nc = S // ts
    seq = sequence_output.astype(jnp.float32)                 # keep (B, S, D): no big transpose
    mask = (sot_positions != 0).astype(jnp.float32)           # (B, S)
    mask_c = mask.reshape(B, nc, ts)                          # (B, nc, ts)
    # lane-dense per-chunk mask layout: (num_chunks, B, ts) — tiny tensor
    mask3 = jnp.transpose(mask_c, (1, 0, 2))

    # --- SMEM scalar prefetch driving the sparsity machinery -----------------
    # per-timestep "any sot across the batch" -> gates each GRU step
    step_any = jnp.any(sot_positions != 0, axis=0).astype(jnp.int32)          # (S,)
    # per-chunk "any sot" -> gates the whole chunk body
    chunk_any = jnp.any(mask_c != 0, axis=(0, 2)).astype(jnp.int32)           # (nc,)
    # fetch_chunk[j]: block index actually DMA'd for chunk j. Empty chunks repeat
    # the last non-empty index, so the pipeliner skips their (Tb,Ts,D) HBM copy.
    idx = jnp.arange(nc, dtype=jnp.int32)
    cand = jnp.where((chunk_any != 0) | (idx == 0), idx, jnp.int32(-1))
    fetch_chunk = lax.cummax(cand, axis=0).astype(jnp.int32)                  # (nc,)

    grid = (B // tb, nc)
    kernel = functools.partial(rs_matching_kernel, ts=ts, d=D)

    return pl.pallas_call(
        kernel,
        out_shape=jax.ShapeDtypeStruct((B, NL), jnp.float32),
        grid_spec=pltpu.PrefetchScalarGridSpec(
            num_scalar_prefetch=3,
            grid=grid,
            in_specs=[
                # seq chunk (streamed; DMA skipped for sot-free chunks via fetch_chunk)
                pl.BlockSpec((tb, ts, D), lambda i, j, ca, fc, sa: (i, fc[j], 0)),
                pl.BlockSpec((1, tb, ts), lambda i, j, ca, fc, sa: (j, i, 0)),   # mask chunk
                pl.BlockSpec((D, G3), lambda i, j, ca, fc, sa: (0, 0)),          # wx (resident)
                pl.BlockSpec((D, G3), lambda i, j, ca, fc, sa: (0, 0)),          # wh (resident)
                pl.BlockSpec((1, G3), lambda i, j, ca, fc, sa: (0, 0)),          # bx
                pl.BlockSpec((1, G3), lambda i, j, ca, fc, sa: (0, 0)),          # bh
                pl.BlockSpec((D, NL), lambda i, j, ca, fc, sa: (0, 0)),          # wc
                pl.BlockSpec((1, NL), lambda i, j, ca, fc, sa: (0, 0)),          # bc
            ],
            out_specs=pl.BlockSpec((tb, NL), lambda i, j, ca, fc, sa: (i, 0)),   # written at last chunk
            scratch_shapes=[pltpu.VMEM((tb, D), jnp.float32)],                   # GRU hidden carry
        ),
        compiler_params=pltpu.CompilerParams(
            dimension_semantics=("parallel", "arbitrary")),
    )(chunk_any, fetch_chunk, step_any, seq, mask3,
      params["wx"], params["wh"], params["bx"], params["bh"],
      params["wc"], params["bc"])


def init_params(key, hidden_size, num_labels):
    """Deterministic init mimicking PyTorch's uniform(-1/sqrt(H), 1/sqrt(H)); fused gate layout."""
    D, NL = hidden_size, num_labels
    k = 1.0 / np.sqrt(D)
    keys = jax.random.split(key, 6)
    u = lambda kk, shape: jax.random.uniform(kk, shape, jnp.float32, -k, k)
    return {
        # fused, pre-transposed (in_features, out_features):
        "wx": u(keys[0], (D, 3 * D)),   # [W_ir | W_iz | W_in]
        "wh": u(keys[1], (D, 3 * D)),   # [W_hr | W_hz | W_hn]
        "bx": u(keys[2], (1, 3 * D)),   # [b_ir | b_iz | b_in]
        "bh": u(keys[3], (1, 3 * D)),   # [b_hr | b_hz | b_hn]   (b_hn stays inside r * (.))
        "wc": u(keys[4], (D, NL)),
        "bc": u(keys[5], (1, NL)),
    }


def reference_forward(sequence_output, sot_positions, params):
    """Pure-JAX replica of the PyTorch loop (explicit gather + sequential GRU + softmax)."""
    seq = np.asarray(sequence_output, np.float32)
    sot = np.asarray(sot_positions)
    B, S, D = seq.shape
    wx, wh, bx, bh = params["wx"], params["wh"], params["bx"], params["bh"]
    out = []
    for b in range(B):
        idx = np.nonzero(sot[b])[0]
        h = jnp.zeros((1, D), jnp.float32)
        for t in idx:
            x = jnp.asarray(seq[b, t][None, :])
            xp = x @ wx + bx
            hp = h @ wh + bh
            r = jax.nn.sigmoid(xp[:, 0:D] + hp[:, 0:D])
            z = jax.nn.sigmoid(xp[:, D:2 * D] + hp[:, D:2 * D])
            n = jnp.tanh(xp[:, 2 * D:3 * D] + r * hp[:, 2 * D:3 * D])
            h = (1.0 - z) * n + z * h
        logits = h @ params["wc"] + params["bc"]
        out.append(jax.nn.softmax(logits, axis=-1)[0])
    return jnp.stack(out)


if __name__ == "__main__":
    B, S, D, NUM_LABELS = 2, 8, 32, 2

    key = jax.random.PRNGKey(0)
    k_seq, k_par = jax.random.split(key)

    sequence_output = jax.random.normal(k_seq, (B, S, D), jnp.float32)
    # sot_positions: nonzero marks start-of-turn tokens; each batch has >= 1
    sot_np = np.zeros((B, S), np.int32)
    sot_np[0, [0, 3, 5]] = 1
    sot_np[1, [1, 4, 6, 7]] = 1
    sot_positions = jnp.asarray(sot_np)

    params = init_params(k_par, D, NUM_LABELS)

    probs = rsmatching_forward(sequence_output, sot_positions, params)
    probs = jax.block_until_ready(probs)

    ref = reference_forward(sequence_output, sot_positions, params)
    assert probs.shape == (B, NUM_LABELS)
    assert np.allclose(np.asarray(probs), np.asarray(ref), atol=5e-5, rtol=5e-5), (
        f"mismatch:\n{probs}\nvs\n{ref}")

    # NOTE: dropout is identity at inference; the labels branch (CrossEntropyLoss)
    # is not part of the inference forward pass implemented here.
    # TODO(synk): training branch (CrossEntropyLoss on logits) intentionally not implemented.
    print("KERNEL_OK")
</pallas_src>

<mosaic_0001>
module attributes {stable_mosaic.version = 11 : i64} {
  func.func @rs_matching_kernel(%arg0: i32, %arg1: i32, %arg2: memref<1xi32, #tpu.memory_space<smem>>, %arg3: memref<1xi32, #tpu.memory_space<smem>>, %arg4: memref<8xi32, #tpu.memory_space<smem>>, %arg5: memref<2x8x32xf32, #tpu.memory_space<vmem>>, %arg6: memref<1x2x8xf32, #tpu.memory_space<vmem>>, %arg7: memref<32x96xf32, #tpu.memory_space<vmem>>, %arg8: memref<32x96xf32, #tpu.memory_space<vmem>>, %arg9: memref<1x96xf32, #tpu.memory_space<vmem>>, %arg10: memref<1x96xf32, #tpu.memory_space<vmem>>, %arg11: memref<32x2xf32, #tpu.memory_space<vmem>>, %arg12: memref<1x2xf32, #tpu.memory_space<vmem>>, %arg13: memref<2x2xf32, #tpu.memory_space<vmem>>, %arg14: memref<2x32xf32, #tpu.memory_space<vmem>>) attributes {dimension_semantics = [#tpu.dimension_semantics<parallel>, #tpu.dimension_semantics<arbitrary>], iteration_bounds = array<i64: 1, 1>, scalar_prefetch = 3 : i64, scratch_operands = 1 : i64, tpu.core_type = #tpu.core_type<tc>, window_params = [{transform_indices = @transform_0, window_bounds = array<i64: 2, 8, 32>}, {transform_indices = @transform_1, window_bounds = array<i64: 1, 2, 8>}, {pipeline_mode = #tpu.pipeline_mode<synchronous>, transform_indices = @transform_2, window_bounds = array<i64: 32, 96>}, {pipeline_mode = #tpu.pipeline_mode<synchronous>, transform_indices = @transform_3, window_bounds = array<i64: 32, 96>}, {pipeline_mode = #tpu.pipeline_mode<synchronous>, transform_indices = @transform_4, window_bounds = array<i64: 1, 96>}, {pipeline_mode = #tpu.pipeline_mode<synchronous>, transform_indices = @transform_5, window_bounds = array<i64: 1, 96>}, {pipeline_mode = #tpu.pipeline_mode<synchronous>, transform_indices = @transform_6, window_bounds = array<i64: 32, 2>}, {pipeline_mode = #tpu.pipeline_mode<synchronous>, transform_indices = @transform_7, window_bounds = array<i64: 1, 2>}, {transform_indices = @transform_8, window_bounds = array<i64: 2, 2>}]} {
    %c0_i32 = arith.constant 0 : i32
    %0 = arith.cmpi eq, %arg1, %c0_i32 : i32
    %1 = arith.extui %0 : i1 to i32
    %c0_i32_0 = arith.constant 0 : i32
    %2 = arith.cmpi ne, %1, %c0_i32_0 : i32
    scf.if %2 {
      %cst = arith.constant 0.000000e+00 : f32
      %11 = vector.broadcast %cst : f32 to vector<2x32xf32>
      %c0 = arith.constant 0 : index
      %c0_5 = arith.constant 0 : index
      %12 = vector.load %arg14[%c0, %c0_5] : memref<2x32xf32, #tpu.memory_space<vmem>>, vector<2x32xf32>
      tpu.vector_store %arg14[%c0, %c0_5], %11 {strides = array<i32>} : memref<2x32xf32, #tpu.memory_space<vmem>>, vector<2x32xf32>,
    } else {
    }
    %3 = arith.index_cast %arg1 : i32 to index
    %4 = memref.load %arg2[%3] : memref<1xi32, #tpu.memory_space<smem>>
    %c0_i32_1 = arith.constant 0 : i32
    %5 = arith.cmpi ne, %4, %c0_i32_1 : i32
    %6 = arith.extui %5 : i1 to i32
    %c0_i32_2 = arith.constant 0 : i32
    %7 = arith.cmpi ne, %6, %c0_i32_2 : i32
    scf.if %7 {
      %c0 = arith.constant 0 : index
      %c0_5 = arith.constant 0 : index
      %c0_6 = arith.constant 0 : index
      %11 = vector.load %arg5[%c0, %c0_5, %c0_6] : memref<2x8x32xf32, #tpu.memory_space<vmem>>, vector<2x8x32xf32>
      %12 = vector.shape_cast %11 : vector<2x8x32xf32> to vector<16x32xf32>
      %c0_7 = arith.constant 0 : index
      %c0_8 = arith.constant 0 : index
      %13 = vector.load %arg7[%c0_7, %c0_8] : memref<32x96xf32, #tpu.memory_space<vmem>>, vector<32x96xf32>
      %cst = arith.constant dense<0.000000e+00> : vector<16x96xf32>
      %14 = tpu.matmul %12, %13, %cst {dimension_numbers = #tpu.dot_dimension_numbers<[1], [0], [0], [1], [0, 0, 1, 1], [], []>} : vector<16x32xf32>, vector<32x96xf32>, vector<16x96xf32> -> vector<16x96xf32>
      %c0_9 = arith.constant 0 : index
      %c0_10 = arith.constant 0 : index
      %15 = vector.load %arg9[%c0_9, %c0_10] : memref<1x96xf32, #tpu.memory_space<vmem>>, vector<1x96xf32>
      %16 = vector.broadcast %15 : vector<1x96xf32> to vector<16x96xf32>
      %17 = arith.addf %14, %16 : vector<16x96xf32>
      %18 = vector.shape_cast %17 : vector<16x96xf32> to vector<2x8x96xf32>
      %c0_11 = arith.constant 0 : index
      %c0_12 = arith.constant 0 : index
      %c0_13 = arith.constant 0 : index
      %19 = vector.load %arg6[%c0_11, %c0_12, %c0_13] : memref<1x2x8xf32, #tpu.memory_space<vmem>>, vector<1x2x8xf32>
      %20 = vector.shape_cast %19 : vector<1x2x8xf32> to vector<2x8xf32>
      %c0_14 = arith.constant 0 : index
      %c0_15 = arith.constant 0 : index
      %21 = vector.load %arg8[%c0_14, %c0_15] : memref<32x96xf32, #tpu.memory_space<vmem>>, vector<32x96xf32>
      %c0_16 = arith.constant 0 : index
      %c0_17 = arith.constant 0 : index
      %22 = vector.load %arg10[%c0_16, %c0_17] : memref<1x96xf32, #tpu.memory_space<vmem>>, vector<1x96xf32>
      %c8_i32 = arith.constant 8 : i32
      %23 = arith.muli %arg1, %c8_i32 : i32
      %c0_i32_18 = arith.constant 0 : i32
      %24 = arith.addi %23, %c0_i32_18 : i32
      %25 = arith.index_cast %24 : i32 to index
      %26 = memref.load %arg4[%25] : memref<8xi32, #tpu.memory_space<smem>>
      %c0_i32_19 = arith.constant 0 : i32
      %27 = arith.cmpi ne, %26, %c0_i32_19 : i32
      %28 = arith.extui %27 : i1 to i32
      %c0_i32_20 = arith.constant 0 : i32
      %29 = arith.cmpi ne, %28, %c0_i32_20 : i32
      scf.if %29 {
        %c0_42 = arith.constant 0 : index
        %c0_43 = arith.constant 0 : index
        %79 = vector.load %arg14[%c0_42, %c0_43] : memref<2x32xf32, #tpu.memory_space<vmem>>, vector<2x32xf32>
        %cst_44 = arith.constant dense<0.000000e+00> : vector<2x96xf32>
        %80 = tpu.matmul %79, %21, %cst_44 {dimension_numbers = #tpu.dot_dimension_numbers<[1], [0], [0], [1], [0, 0, 1, 1], [], []>} : vector<2x32xf32>, vector<32x96xf32>, vector<2x96xf32> -> vector<2x96xf32>
        %81 = vector.broadcast %22 : vector<1x96xf32> to vector<2x96xf32>
        %82 = arith.addf %80, %81 : vector<2x96xf32>
        %83 = vector.extract_strided_slice %18 {offsets = [0, 0, 0], sizes = [2, 1, 96], strides = [1, 1, 1]} : vector<2x8x96xf32> to vector<2x1x96xf32>
        %84 = vector.shape_cast %83 : vector<2x1x96xf32> to vector<2x96xf32>
        %85 = vector.extract_strided_slice %84 {offsets = [0, 0], sizes = [2, 32], strides = [1, 1]} : vector<2x96xf32> to vector<2x32xf32>
        %86 = vector.extract_strided_slice %82 {offsets = [0, 0], sizes = [2, 32], strides = [1, 1]} : vector<2x96xf32> to vector<2x32xf32>
        %87 = arith.addf %85, %86 : vector<2x32xf32>
        %cst_45 = arith.constant 5.000000e-01 : f32
        %88 = vector.broadcast %cst_45 : f32 to vector<2x32xf32>
        %89 = arith.mulf %88, %87 : vector<2x32xf32>
        %90 = math.tanh %89 : vector<2x32xf32>
        %cst_46 = arith.constant 1.000000e+00 : f32
        %91 = vector.broadcast %cst_46 : f32 to vector<2x32xf32>
        %92 = arith.addf %90, %91 : vector<2x32xf32>
        %cst_47 = arith.constant 5.000000e-01 : f32
        %93 = vector.broadcast %cst_47 : f32 to vector<2x32xf32>
        %94 = arith.mulf %93, %92 : vector<2x32xf32>
        %95 = vector.extract_strided_slice %84 {offsets = [0, 32], sizes = [2, 32], strides = [1, 1]} : vector<2x96xf32> to vector<2x32xf32>
        %96 = vector.extract_strided_slice %82 {offsets = [0, 32], sizes = [2, 32], strides = [1, 1]} : vector<2x96xf32> to vector<2x32xf32>
        %97 = arith.addf %95, %96 : vector<2x32xf32>
        %cst_48 = arith.constant 5.000000e-01 : f32
        %98 = vector.broadcast %cst_48 : f32 to vector<2x32xf32>
        %99 = arith.mulf %98, %97 : vector<2x32xf32>
        %100 = math.tanh %99 : vector<2x32xf32>
        %cst_49 = arith.constant 1.000000e+00 : f32
        %101 = vector.broadcast %cst_49 : f32 to vector<2x32xf32>
        %102 = arith.addf %100, %101 : vector<2x32xf32>
        %cst_50 = arith.constant 5.000000e-01 : f32
        %103 = vector.broadcast %cst_50 : f32 to vector<2x32xf32>
        %104 = arith.mulf %103, %102 : vector<2x32xf32>
        %105 = vector.extract_strided_slice %84 {offsets = [0, 64], sizes = [2, 32], strides = [1, 1]} : vector<2x96xf32> to vector<2x32xf32>
        %106 = vector.extract_strided_slice %82 {offsets = [0, 64], sizes = [2, 32], strides = [1, 1]} : vector<2x96xf32> to vector<2x32xf32>
        %107 = arith.mulf %94, %106 : vector<2x32xf32>
        %108 = arith.addf %105, %107 : vector<2x32xf32>
        %109 = math.tanh %108 : vector<2x32xf32>
        %cst_51 = arith.constant 1.000000e+00 : f32
        %110 = vector.broadcast %cst_51 : f32 to vector<2x32xf32>
        %111 = arith.subf %110, %104 : vector<2x32xf32>
        %112 = arith.mulf %111, %109 : vector<2x32xf32>
        %113 = arith.mulf %104, %79 : vector<2x32xf32>
        %114 = arith.addf %112, %113 : vector<2x32xf32>
        %115 = vector.extract_strided_slice %20 {offsets = [0, 0], sizes = [2, 1], strides = [1, 1]} : vector<2x8xf32> to vector<2x1xf32>
        %116 = vector.broadcast %115 : vector<2x1xf32> to vector<2x32xf32>
        %117 = arith.mulf %116, %114 : vector<2x32xf32>
        %cst_52 = arith.constant 1.000000e+00 : f32
        %118 = vector.broadcast %cst_52 : f32 to vector<2x1xf32>
        %119 = arith.subf %118, %115 : vector<2x1xf32>
        %120 = vector.broadcast %119 : vector<2x1xf32> to vector<2x32xf32>
        %121 = arith.mulf %120, %79 : vector<2x32xf32>
        %122 = arith.addf %117, %121 : vector<2x32xf32>
        %c0_53 = arith.constant 0 : index
        %c0_54 = arith.constant 0 : index
        %123 = vector.load %arg14[%c0_53, %c0_54] : memref<2x32xf32, #tpu.memory_space<vmem>>, vector<2x32xf32>
        tpu.vector_store %arg14[%c0_53, %c0_54], %122 {strides = array<i32>} : memref<2x32xf32, #tpu.memory_space<vmem>>, vector<2x32xf32>,
      } else {
      }
      %c8_i32_21 = arith.constant 8 : i32
      %30 = arith.muli %arg1, %c8_i32_21 : i32
      %c1_i32 = arith.constant 1 : i32
      %31 = arith.addi %30, %c1_i32 : i32
      %32 = arith.index_cast %31 : i32 to index
      %33 = memref.load %arg4[%32] : memref<8xi32, #tpu.memory_space<smem>>
      %c0_i32_22 = arith.constant 0 : i32
      %34 = arith.cmpi ne, %33, %c0_i32_22 : i32
      %35 = arith.extui %34 : i1 to i32
      %c0_i32_23 = arith.constant 0 : i32
      %36 = arith.cmpi ne, %35, %c0_i32_23 : i32
      scf.if %36 {
        %c0_42 = arith.constant 0 : index
        %c0_43 = arith.constant 0 : index
        %79 = vector.load %arg14[%c0_42, %c0_43] : memref<2x32xf32, #tpu.memory_space<vmem>>, vector<2x32xf32>
        %cst_44 = arith.constant dense<0.000000e+00> : vector<2x96xf32>
        %80 = tpu.matmul %79, %21, %cst_44 {dimension_numbers = #tpu.dot_dimension_numbers<[1], [0], [0], [1], [0, 0, 1, 1], [], []>} : vector<2x32xf32>, vector<32x96xf32>, vector<2x96xf32> -> vector<2x96xf32>
        %81 = vector.broadcast %22 : vector<1x96xf32> to vector<2x96xf32>
        %82 = arith.addf %80, %81 : vector<2x96xf32>
        %83 = vector.extract_strided_slice %18 {offsets = [0, 1, 0], sizes = [2, 1, 96], strides = [1, 1, 1]} : vector<2x8x96xf32> to vector<2x1x96xf32>
        %84 = vector.shape_cast %83 : vector<2x1x96xf32> to vector<2x96xf32>
        %85 = vector.extract_strided_slice %84 {offsets = [0, 0], sizes = [2, 32], strides = [1, 1]} : vector<2x96xf32> to vector<2x32xf32>
        %86 = vector.extract_strided_slice %82 {offsets = [0, 0], sizes = [2, 32], strides = [1, 1]} : vector<2x96xf32> to vector<2x32xf32>
        %87 = arith.addf %85, %86 : vector<2x32xf32>
        %cst_45 = arith.constant 5.000000e-01 : f32
        %88 = vector.broadcast %cst_45 : f32 to vector<2x32xf32>
        %89 = arith.mulf %88, %87 : vector<2x32xf32>
        %90 = math.tanh %89 : vector<2x32xf32>
        %cst_46 = arith.constant 1.000000e+00 : f32
        %91 = vector.broadcast %cst_46 : f32 to vector<2x32xf32>
        %92 = arith.addf %90, %91 : vector<2x32xf32>
        %cst_47 = arith.constant 5.000000e-01 : f32
        %93 = vector.broadcast %cst_47 : f32 to vector<2x32xf32>
        %94 = arith.mulf %93, %92 : vector<2x32xf32>
        %95 = vector.extract_strided_slice %84 {offsets = [0, 32], sizes = [2, 32], strides = [1, 1]} : vector<2x96xf32> to vector<2x32xf32>
        %96 = vector.extract_strided_slice %82 {offsets = [0, 32], sizes = [2, 32], strides = [1, 1]} : vector<2x96xf32> to vector<2x32xf32>
        %97 = arith.addf %95, %96 : vector<2x32xf32>
        %cst_48 = arith.constant 5.000000e-01 : f32
        %98 = vector.broadcast %cst_48 : f32 to vector<2x32xf32>
        %99 = arith.mulf %98, %97 : vector<2x32xf32>
        %100 = math.tanh %99 : vector<2x32xf32>
        %cst_49 = arith.constant 1.000000e+00 : f32
        %101 = vector.broadcast %cst_49 : f32 to vector<2x32xf32>
        %102 = arith.addf %100, %101 : vector<2x32xf32>
        %cst_50 = arith.constant 5.000000e-01 : f32
        %103 = vector.broadcast %cst_50 : f32 to vector<2x32xf32>
        %104 = arith.mulf %103, %102 : vector<2x32xf32>
        %105 = vector.extract_strided_slice %84 {offsets = [0, 64], sizes = [2, 32], strides = [1, 1]} : vector<2x96xf32> to vector<2x32xf32>
        %106 = vector.extract_strided_slice %82 {offsets = [0, 64], sizes = [2, 32], strides = [1, 1]} : vector<2x96xf32> to vector<2x32xf32>
        %107 = arith.mulf %94, %106 : vector<2x32xf32>
        %108 = arith.addf %105, %107 : vector<2x32xf32>
        %109 = math.tanh %108 : vector<2x32xf32>
        %cst_51 = arith.constant 1.000000e+00 : f32
        %110 = vector.broadcast %cst_51 : f32 to vector<2x32xf32>
        %111 = arith.subf %110, %104 : vector<2x32xf32>
        %112 = arith.mulf %111, %109 : vector<2x32xf32>
        %113 = arith.mulf %104, %79 : vector<2x32xf32>
        %114 = arith.addf %112, %113 : vector<2x32xf32>
        %115 = vector.extract_strided_slice %20 {offsets = [0, 1], sizes = [2, 1], strides = [1, 1]} : vector<2x8xf32> to vector<2x1xf32>
        %116 = vector.broadcast %115 : vector<2x1xf32> to vector<2x32xf32>
        %117 = arith.mulf %116, %114 : vector<2x32xf32>
        %cst_52 = arith.constant 1.000000e+00 : f32
        %118 = vector.broadcast %cst_52 : f32 to vector<2x1xf32>
        %119 = arith.subf %118, %115 : vector<2x1xf32>
        %120 = vector.broadcast %119 : vector<2x1xf32> to vector<2x32xf32>
        %121 = arith.mulf %120, %79 : vector<2x32xf32>
        %122 = arith.addf %117, %121 : vector<2x32xf32>
        %c0_53 = arith.constant 0 : index
        %c0_54 = arith.constant 0 : index
        %123 = vector.load %arg14[%c0_53, %c0_54] : memref<2x32xf32, #tpu.memory_space<vmem>>, vector<2x32xf32>
        tpu.vector_store %arg14[%c0_53, %c0_54], %122 {strides = array<i32>} : memref<2x32xf32, #tpu.memory_space<vmem>>, vector<2x32xf32>,
      } else {
      }
      %c8_i32_24 = arith.constant 8 : i32
      %37 = arith.muli %arg1, %c8_i32_24 : i32
      %c2_i32 = arith.constant 2 : i32
      %38 = arith.addi %37, %c2_i32 : i32
      %39 = arith.index_cast %38 : i32 to index
      %40 = memref.load %arg4[%39] : memref<8xi32, #tpu.memory_space<smem>>
      %c0_i32_25 = arith.constant 0 : i32
      %41 = arith.cmpi ne, %40, %c0_i32_25 : i32
      %42 = arith.extui %41 : i1 to i32
      %c0_i32_26 = arith.constant 0 : i32
      %43 = arith.cmpi ne, %42, %c0_i32_26 : i32
      scf.if %43 {
        %c0_42 = arith.constant 0 : index
        %c0_43 = arith.constant 0 : index
        %79 = vector.load %arg14[%c0_42, %c0_43] : memref<2x32xf32, #tpu.memory_space<vmem>>, vector<2x32xf32>
        %cst_44 = arith.constant dense<0.000000e+00> : vector<2x96xf32>
        %80 = tpu.matmul %79, %21, %cst_44 {dimension_numbers = #tpu.dot_dimension_numbers<[1], [0], [0], [1], [0, 0, 1, 1], [], []>} : vector<2x32xf32>, vector<32x96xf32>, vector<2x96xf32> -> vector<2x96xf32>
        %81 = vector.broadcast %22 : vector<1x96xf32> to vector<2x96xf32>
        %82 = arith.addf %80, %81 : vector<2x96xf32>
        %83 = vector.extract_strided_slice %18 {offsets = [0, 2, 0], sizes = [2, 1, 96], strides = [1, 1, 1]} : vector<2x8x96xf32> to vector<2x1x96xf32>
        %84 = vector.shape_cast %83 : vector<2x1x96xf32> to vector<2x96xf32>
        %85 = vector.extract_strided_slice %84 {offsets = [0, 0], sizes = [2, 32], strides = [1, 1]} : vector<2x96xf32> to vector<2x32xf32>
        %86 = vector.extract_strided_slice %82 {offsets = [0, 0], sizes = [2, 32], strides = [1, 1]} : vector<2x96xf32> to vector<2x32xf32>
        %87 = arith.addf %85, %86 : vector<2x32xf32>
        %cst_45 = arith.constant 5.000000e-01 : f32
        %88 = vector.broadcast %cst_45 : f32 to vector<2x32xf32>
        %89 = arith.mulf %88, %87 : vector<2x32xf32>
        %90 = math.tanh %89 : vector<2x32xf32>
        %cst_46 = arith.constant 1.000000e+00 : f32
        %91 = vector.broadcast %cst_46 : f32 to vector<2x32xf32>
        %92 = arith.addf %90, %91 : vector<2x32xf32>
        %cst_47 = arith.constant 5.000000e-01 : f32
        %93 = vector.broadcast %cst_47 : f32 to vector<2x32xf32>
        %94 = arith.mulf %93, %92 : vector<2x32xf32>
        %95 = vector.extract_strided_slice %84 {offsets = [0, 32], sizes = [2, 32], strides = [1, 1]} : vector<2x96xf32> to vector<2x32xf32>
        %96 = vector.extract_strided_slice %82 {offsets = [0, 32], sizes = [2, 32], strides = [1, 1]} : vector<2x96xf32> to vector<2x32xf32>
        %97 = arith.addf %95, %96 : vector<2x32xf32>
        %cst_48 = arith.constant 5.000000e-01 : f32
        %98 = vector.broadcast %cst_48 : f32 to vector<2x32xf32>
        %99 = arith.mulf %98, %97 : vector<2x32xf32>
        %100 = math.tanh %99 : vector<2x32xf32>
        %cst_49 = arith.constant 1.000000e+00 : f32
        %101 = vector.broadcast %cst_49 : f32 to vector<2x32xf32>
        %102 = arith.addf %100, %101 : vector<2x32xf32>
        %cst_50 = arith.constant 5.000000e-01 : f32
        %103 = vector.broadcast %cst_50 : f32 to vector<2x32xf32>
        %104 = arith.mulf %103, %102 : vector<2x32xf32>
        %105 = vector.extract_strided_slice %84 {offsets = [0, 64], sizes = [2, 32], strides = [1, 1]} : vector<2x96xf32> to vector<2x32xf32>
        %106 = vector.extract_strided_slice %82 {offsets = [0, 64], sizes = [2, 32], strides = [1, 1]} : vector<2x96xf32> to vector<2x32xf32>
        %107 = arith.mulf %94, %106 : vector<2x32xf32>
        %108 = arith.addf %105, %107 : vector<2x32xf32>
        %109 = math.tanh %108 : vector<2x32xf32>
        %cst_51 = arith.constant 1.000000e+00 : f32
        %110 = vector.broadcast %cst_51 : f32 to vector<2x32xf32>
        %111 = arith.subf %110, %104 : vector<2x32xf32>
        %112 = arith.mulf %111, %109 : vector<2x32xf32>
        %113 = arith.mulf %104, %79 : vector<2x32xf32>
        %114 = arith.addf %112, %113 : vector<2x32xf32>
        %115 = vector.extract_strided_slice %20 {offsets = [0, 2], sizes = [2, 1], strides = [1, 1]} : vector<2x8xf32> to vector<2x1xf32>
        %116 = vector.broadcast %115 : vector<2x1xf32> to vector<2x32xf32>
        %117 = arith.mulf %116, %114 : vector<2x32xf32>
        %cst_52 = arith.constant 1.000000e+00 : f32
        %118 = vector.broadcast %cst_52 : f32 to vector<2x1xf32>
        %119 = arith.subf %118, %115 : vector<2x1xf32>
        %120 = vector.broadcast %119 : vector<2x1xf32> to vector<2x32xf32>
        %121 = arith.mulf %120, %79 : vector<2x32xf32>
        %122 = arith.addf %117, %121 : vector<2x32xf32>
        %c0_53 = arith.constant 0 : index
        %c0_54 = arith.constant 0 : index
        %123 = vector.load %arg14[%c0_53, %c0_54] : memref<2x32xf32, #tpu.memory_space<vmem>>, vector<2x32xf32>
        tpu.vector_store %arg14[%c0_53, %c0_54], %122 {strides = array<i32>} : memref<2x32xf32, #tpu.memory_space<vmem>>, vector<2x32xf32>,
      } else {
      }
      %c8_i32_27 = arith.constant 8 : i32
      %44 = arith.muli %arg1, %c8_i32_27 : i32
      %c3_i32 = arith.constant 3 : i32
      %45 = arith.addi %44, %c3_i32 : i32
      %46 = arith.index_cast %45 : i32 to index
      %47 = memref.load %arg4[%46] : memref<8xi32, #tpu.memory_space<smem>>
      %c0_i32_28 = arith.constant 0 : i32
      %48 = arith.cmpi ne, %47, %c0_i32_28 : i32
      %49 = arith.extui %48 : i1 to i32
      %c0_i32_29 = arith.constant 0 : i32
      %50 = arith.cmpi ne, %49, %c0_i32_29 : i32
      scf.if %50 {
        %c0_42 = arith.constant 0 : index
        %c0_43 = arith.constant 0 : index
        %79 = vector.load %arg14[%c0_42, %c0_43] : memref<2x32xf32, #tpu.memory_space<vmem>>, vector<2x32xf32>
        %cst_44 = arith.constant dense<0.000000e+00> : vector<2x96xf32>
        %80 = tpu.matmul %79, %21, %cst_44 {dimension_numbers = #tpu.dot_dimension_numbers<[1], [0], [0], [1], [0, 0, 1, 1], [], []>} : vector<2x32xf32>, vector<32x96xf32>, vector<2x96xf32> -> vector<2x96xf32>
        %81 = vector.broadcast %22 : vector<1x96xf32> to vector<2x96xf32>
        %82 = arith.addf %80, %81 : vector<2x96xf32>
        %83 = vector.extract_strided_slice %18 {offsets = [0, 3, 0], sizes = [2, 1, 96], strides = [1, 1, 1]} : vector<2x8x96xf32> to vector<2x1x96xf32>
        %84 = vector.shape_cast %83 : vector<2x1x96xf32> to vector<2x96xf32>
        %85 = vector.extract_strided_slice %84 {offsets = [0, 0], sizes = [2, 32], strides = [1, 1]} : vector<2x96xf32> to vector<2x32xf32>
        %86 = vector.extract_strided_slice %82 {offsets = [0, 0], sizes = [2, 32], strides = [1, 1]} : vector<2x96xf32> to vector<2x32xf32>
        %87 = arith.addf %85, %86 : vector<2x32xf32>
        %cst_45 = arith.constant 5.000000e-01 : f32
        %88 = vector.broadcast %cst_45 : f32 to vector<2x32xf32>
        %89 = arith.mulf %88, %87 : vector<2x32xf32>
        %90 = math.tanh %89 : vector<2x32xf32>
        %cst_46 = arith.constant 1.000000e+00 : f32
        %91 = vector.broadcast %cst_46 : f32 to vector<2x32xf32>
        %92 = arith.addf %90, %91 : vector<2x32xf32>
        %cst_47 = arith.constant 5.000000e-01 : f32
        %93 = vector.broadcast %cst_47 : f32 to vector<2x32xf32>
        %94 = arith.mulf %93, %92 : vector<2x32xf32>
        %95 = vector.extract_strided_slice %84 {offsets = [0, 32], sizes = [2, 32], strides = [1, 1]} : vector<2x96xf32> to vector<2x32xf32>
        %96 = vector.extract_strided_slice %82 {offsets = [0, 32], sizes = [2, 32], strides = [1, 1]} : vector<2x96xf32> to vector<2x32xf32>
        %97 = arith.addf %95, %96 : vector<2x32xf32>
        %cst_48 = arith.constant 5.000000e-01 : f32
        %98 = vector.broadcast %cst_48 : f32 to vector<2x32xf32>
        %99 = arith.mulf %98, %97 : vector<2x32xf32>
        %100 = math.tanh %99 : vector<2x32xf32>
        %cst_49 = arith.constant 1.000000e+00 : f32
        %101 = vector.broadcast %cst_49 : f32 to vector<2x32xf32>
        %102 = arith.addf %100, %101 : vector<2x32xf32>
        %cst_50 = arith.constant 5.000000e-01 : f32
        %103 = vector.broadcast %cst_50 : f32 to vector<2x32xf32>
        %104 = arith.mulf %103, %102 : vector<2x32xf32>
        %105 = vector.extract_strided_slice %84 {offsets = [0, 64], sizes = [2, 32], strides = [1, 1]} : vector<2x96xf32> to vector<2x32xf32>
        %106 = vector.extract_strided_slice %82 {offsets = [0, 64], sizes = [2, 32], strides = [1, 1]} : vector<2x96xf32> to vector<2x32xf32>
        %107 = arith.mulf %94, %106 : vector<2x32xf32>
        %108 = arith.addf %105, %107 : vector<2x32xf32>
        %109 = math.tanh %108 : vector<2x32xf32>
        %cst_51 = arith.constant 1.000000e+00 : f32
        %110 = vector.broadcast %cst_51 : f32 to vector<2x32xf32>
        %111 = arith.subf %110, %104 : vector<2x32xf32>
        %112 = arith.mulf %111, %109 : vector<2x32xf32>
        %113 = arith.mulf %104, %79 : vector<2x32xf32>
        %114 = arith.addf %112, %113 : vector<2x32xf32>
        %115 = vector.extract_strided_slice %20 {offsets = [0, 3], sizes = [2, 1], strides = [1, 1]} : vector<2x8xf32> to vector<2x1xf32>
        %116 = vector.broadcast %115 : vector<2x1xf32> to vector<2x32xf32>
        %117 = arith.mulf %116, %114 : vector<2x32xf32>
        %cst_52 = arith.constant 1.000000e+00 : f32
        %118 = vector.broadcast %cst_52 : f32 to vector<2x1xf32>
        %119 = arith.subf %118, %115 : vector<2x1xf32>
        %120 = vector.broadcast %119 : vector<2x1xf32> to vector<2x32xf32>
        %121 = arith.mulf %120, %79 : vector<2x32xf32>
        %122 = arith.addf %117, %121 : vector<2x32xf32>
        %c0_53 = arith.constant 0 : index
        %c0_54 = arith.constant 0 : index
        %123 = vector.load %arg14[%c0_53, %c0_54] : memref<2x32xf32, #tpu.memory_space<vmem>>, vector<2x32xf32>
        tpu.vector_store %arg14[%c0_53, %c0_54], %122 {strides = array<i32>} : memref<2x32xf32, #tpu.memory_space<vmem>>, vector<2x32xf32>,
      } else {
      }
      %c8_i32_30 = arith.constant 8 : i32
      %51 = arith.muli %arg1, %c8_i32_30 : i32
      %c4_i32 = arith.constant 4 : i32
      %52 = arith.addi %51, %c4_i32 : i32
      %53 = arith.index_cast %52 : i32 to index
      %54 = memref.load %arg4[%53] : memref<8xi32, #tpu.memory_space<smem>>
      %c0_i32_31 = arith.constant 0 : i32
      %55 = arith.cmpi ne, %54, %c0_i32_31 : i32
      %56 = arith.extui %55 : i1 to i32
      %c0_i32_32 = arith.constant 0 : i32
      %57 = arith.cmpi ne, %56, %c0_i32_32 : i32
      scf.if %57 {
        %c0_42 = arith.constant 0 : index
        %c0_43 = arith.constant 0 : index
        %79 = vector.load %arg14[%c0_42, %c0_43] : memref<2x32xf32, #tpu.memory_space<vmem>>, vector<2x32xf32>
        %cst_44 = arith.constant dense<0.000000e+00> : vector<2x96xf32>
        %80 = tpu.matmul %79, %21, %cst_44 {dimension_numbers = #tpu.dot_dimension_numbers<[1], [0], [0], [1], [0, 0, 1, 1], [], []>} : vector<2x32xf32>, vector<32x96xf32>, vector<2x96xf32> -> vector<2x96xf32>
        %81 = vector.broadcast %22 : vector<1x96xf32> to vector<2x96xf32>
        %82 = arith.addf %80, %81 : vector<2x96xf32>
        %83 = vector.extract_strided_slice %18 {offsets = [0, 4, 0], sizes = [2, 1, 96], strides = [1, 1, 1]} : vector<2x8x96xf32> to vector<2x1x96xf32>
        %84 = vector.shape_cast %83 : vector<2x1x96xf32> to vector<2x96xf32>
        %85 = vector.extract_strided_slice %84 {offsets = [0, 0], sizes = [2, 32], strides = [1, 1]} : vector<2x96xf32> to vector<2x32xf32>
        %86 = vector.extract_strided_slice %82 {offsets = [0, 0], sizes = [2, 32], strides = [1, 1]} : vector<2x96xf32> to vector<2x32xf32>
        %87 = arith.addf %85, %86 : vector<2x32xf32>
        %cst_45 = arith.constant 5.000000e-01 : f32
        %88 = vector.broadcast %cst_45 : f32 to vector<2x32xf32>
        %89 = arith.mulf %88, %87 : vector<2x32xf32>
        %90 = math.tanh %89 : vector<2x32xf32>
        %cst_46 = arith.constant 1.000000e+00 : f32
        %91 = vector.broadcast %cst_46 : f32 to vector<2x32xf32>
        %92 = arith.addf %90, %91 : vector<2x32xf32>
        %cst_47 = arith.constant 5.000000e-01 : f32
        %93 = vector.broadcast %cst_47 : f32 to vector<2x32xf32>
        %94 = arith.mulf %93, %92 : vector<2x32xf32>
        %95 = vector.extract_strided_slice %84 {offsets = [0, 32], sizes = [2, 32], strides = [1, 1]} : vector<2x96xf32> to vector<2x32xf32>
        %96 = vector.extract_strided_slice %82 {offsets = [0, 32], sizes = [2, 32], strides = [1, 1]} : vector<2x96xf32> to vector<2x32xf32>
        %97 = arith.addf %95, %96 : vector<2x32xf32>
        %cst_48 = arith.constant 5.000000e-01 : f32
        %98 = vector.broadcast %cst_48 : f32 to vector<2x32xf32>
        %99 = arith.mulf %98, %97 : vector<2x32xf32>
        %100 = math.tanh %99 : vector<2x32xf32>
        %cst_49 = arith.constant 1.000000e+00 : f32
        %101 = vector.broadcast %cst_49 : f32 to vector<2x32xf32>
        %102 = arith.addf %100, %101 : vector<2x32xf32>
        %cst_50 = arith.constant 5.000000e-01 : f32
        %103 = vector.broadcast %cst_50 : f32 to vector<2x32xf32>
        %104 = arith.mulf %103, %102 : vector<2x32xf32>
        %105 = vector.extract_strided_slice %84 {offsets = [0, 64], sizes = [2, 32], strides = [1, 1]} : vector<2x96xf32> to vector<2x32xf32>
        %106 = vector.extract_strided_slice %82 {offsets = [0, 64], sizes = [2, 32], strides = [1, 1]} : vector<2x96xf32> to vector<2x32xf32>
        %107 = arith.mulf %94, %106 : vector<2x32xf32>
        %108 = arith.addf %105, %107 : vector<2x32xf32>
        %109 = math.tanh %108 : vector<2x32xf32>
        %cst_51 = arith.constant 1.000000e+00 : f32
        %110 = vector.broadcast %cst_51 : f32 to vector<2x32xf32>
        %111 = arith.subf %110, %104 : vector<2x32xf32>
        %112 = arith.mulf %111, %109 : vector<2x32xf32>
        %113 = arith.mulf %104, %79 : vector<2x32xf32>
        %114 = arith.addf %112, %113 : vector<2x32xf32>
        %115 = vector.extract_strided_slice %20 {offsets = [0, 4], sizes = [2, 1], strides = [1, 1]} : vector<2x8xf32> to vector<2x1xf32>
        %116 = vector.broadcast %115 : vector<2x1xf32> to vector<2x32xf32>
        %117 = arith.mulf %116, %114 : vector<2x32xf32>
        %cst_52 = arith.constant 1.000000e+00 : f32
        %118 = vector.broadcast %cst_52 : f32 to vector<2x1xf32>
        %119 = arith.subf %118, %115 : vector<2x1xf32>
        %120 = vector.broadcast %119 : vector<2x1xf32> to vector<2x32xf32>
        %121 = arith.mulf %120, %79 : vector<2x32xf32>
        %122 = arith.addf %117, %121 : vector<2x32xf32>
        %c0_53 = arith.constant 0 : index
        %c0_54 = arith.constant 0 : index
        %123 = vector.load %arg14[%c0_53, %c0_54] : memref<2x32xf32, #tpu.memory_space<vmem>>, vector<2x32xf32>
        tpu.vector_store %arg14[%c0_53, %c0_54], %122 {strides = array<i32>} : memref<2x32xf32, #tpu.memory_space<vmem>>, vector<2x32xf32>,
      } else {
      }
      %c8_i32_33 = arith.constant 8 : i32
      %58 = arith.muli %arg1, %c8_i32_33 : i32
      %c5_i32 = arith.constant 5 : i32
      %59 = arith.addi %58, %c5_i32 : i32
      %60 = arith.index_cast %59 : i32 to index
      %61 = memref.load %arg4[%60] : memref<8xi32, #tpu.memory_space<smem>>
      %c0_i32_34 = arith.constant 0 : i32
      %62 = arith.cmpi ne, %61, %c0_i32_34 : i32
      %63 = arith.extui %62 : i1 to i32
      %c0_i32_35 = arith.constant 0 : i32
      %64 = arith.cmpi ne, %63, %c0_i32_35 : i32
      scf.if %64 {
        %c0_42 = arith.constant 0 : index
        %c0_43 = arith.constant 0 : index
        %79 = vector.load %arg14[%c0_42, %c0_43] : memref<2x32xf32, #tpu.memory_space<vmem>>, vector<2x32xf32>
        %cst_44 = arith.constant dense<0.000000e+00> : vector<2x96xf32>
        %80 = tpu.matmul %79, %21, %cst_44 {dimension_numbers = #tpu.dot_dimension_numbers<[1], [0], [0], [1], [0, 0, 1, 1], [], []>} : vector<2x32xf32>, vector<32x96xf32>, vector<2x96xf32> -> vector<2x96xf32>
        %81 = vector.broadcast %22 : vector<1x96xf32> to vector<2x96xf32>
        %82 = arith.addf %80, %81 : vector<2x96xf32>
        %83 = vector.extract_strided_slice %18 {offsets = [0, 5, 0], sizes = [2, 1, 96], strides = [1, 1, 1]} : vector<2x8x96xf32> to vector<2x1x96xf32>
        %84 = vector.shape_cast %83 : vector<2x1x96xf32> to vector<2x96xf32>
        %85 = vector.extract_strided_slice %84 {offsets = [0, 0], sizes = [2, 32], strides = [1, 1]} : vector<2x96xf32> to vector<2x32xf32>
        %86 = vector.extract_strided_slice %82 {offsets = [0, 0], sizes = [2, 32], strides = [1, 1]} : vector<2x96xf32> to vector<2x32xf32>
        %87 = arith.addf %85, %86 : vector<2x32xf32>
        %cst_45 = arith.constant 5.000000e-01 : f32
        %88 = vector.broadcast %cst_45 : f32 to vector<2x32xf32>
        %89 = arith.mulf %88, %87 : vector<2x32xf32>
        %90 = math.tanh %89 : vector<2x32xf32>
        %cst_46 = arith.constant 1.000000e+00 : f32
        %91 = vector.broadcast %cst_46 : f32 to vector<2x32xf32>
        %92 = arith.addf %90, %91 : vector<2x32xf32>
        %cst_47 = arith.constant 5.000000e-01 : f32
        %93 = vector.broadcast %cst_47 : f32 to vector<2x32xf32>
        %94 = arith.mulf %93, %92 : vector<2x32xf32>
        %95 = vector.extract_strided_slice %84 {offsets = [0, 32], sizes = [2, 32], strides = [1, 1]} : vector<2x96xf32> to vector<2x32xf32>
        %96 = vector.extract_strided_slice %82 {offsets = [0, 32], sizes = [2, 32], strides = [1, 1]} : vector<2x96xf32> to vector<2x32xf32>
        %97 = arith.addf %95, %96 : vector<2x32xf32>
        %cst_48 = arith.constant 5.000000e-01 : f32
        %98 = vector.broadcast %cst_48 : f32 to vector<2x32xf32>
        %99 = arith.mulf %98, %97 : vector<2x32xf32>
        %100 = math.tanh %99 : vector<2x32xf32>
        %cst_49 = arith.constant 1.000000e+00 : f32
        %101 = vector.broadcast %cst_49 : f32 to vector<2x32xf32>
        %102 = arith.addf %100, %101 : vector<2x32xf32>
        %cst_50 = arith.constant 5.000000e-01 : f32
        %103 = vector.broadcast %cst_50 : f32 to vector<2x32xf32>
        %104 = arith.mulf %103, %102 : vector<2x32xf32>
        %105 = vector.extract_strided_slice %84 {offsets = [0, 64], sizes = [2, 32], strides = [1, 1]} : vector<2x96xf32> to vector<2x32xf32>
        %106 = vector.extract_strided_slice %82 {offsets = [0, 64], sizes = [2, 32], strides = [1, 1]} : vector<2x96xf32> to vector<2x32xf32>
        %107 = arith.mulf %94, %106 : vector<2x32xf32>
        %108 = arith.addf %105, %107 : vector<2x32xf32>
        %109 = math.tanh %108 : vector<2x32xf32>
        %cst_51 = arith.constant 1.000000e+00 : f32
        %110 = vector.broadcast %cst_51 : f32 to vector<2x32xf32>
        %111 = arith.subf %110, %104 : vector<2x32xf32>
        %112 = arith.mulf %111, %109 : vector<2x32xf32>
        %113 = arith.mulf %104, %79 : vector<2x32xf32>
        %114 = arith.addf %112, %113 : vector<2x32xf32>
        %115 = vector.extract_strided_slice %20 {offsets = [0, 5], sizes = [2, 1], strides = [1, 1]} : vector<2x8xf32> to vector<2x1xf32>
        %116 = vector.broadcast %115 : vector<2x1xf32> to vector<2x32xf32>
        %117 = arith.mulf %116, %114 : vector<2x32xf32>
        %cst_52 = arith.constant 1.000000e+00 : f32
        %118 = vector.broadcast %cst_52 : f32 to vector<2x1xf32>
        %119 = arith.subf %118, %115 : vector<2x1xf32>
        %120 = vector.broadcast %119 : vector<2x1xf32> to vector<2x32xf32>
        %121 = arith.mulf %120, %79 : vector<2x32xf32>
        %122 = arith.addf %117, %121 : vector<2x32xf32>
        %c0_53 = arith.constant 0 : index
        %c0_54 = arith.constant 0 : index
        %123 = vector.load %arg14[%c0_53, %c0_54] : memref<2x32xf32, #tpu.memory_space<vmem>>, vector<2x32xf32>
        tpu.vector_store %arg14[%c0_53, %c0_54], %122 {strides = array<i32>} : memref<2x32xf32, #tpu.memory_space<vmem>>, vector<2x32xf32>,
      } else {
      }
      %c8_i32_36 = arith.constant 8 : i32
      %65 = arith.muli %arg1, %c8_i32_36 : i32
      %c6_i32 = arith.constant 6 : i32
      %66 = arith.addi %65, %c6_i32 : i32
      %67 = arith.index_cast %66 : i32 to index
      %68 = memref.load %arg4[%67] : memref<8xi32, #tpu.memory_space<smem>>
      %c0_i32_37 = arith.constant 0 : i32
      %69 = arith.cmpi ne, %68, %c0_i32_37 : i32
      %70 = arith.extui %69 : i1 to i32
      %c0_i32_38 = arith.constant 0 : i32
      %71 = arith.cmpi ne, %70, %c0_i32_38 : i32
      scf.if %71 {
        %c0_42 = arith.constant 0 : index
        %c0_43 = arith.constant 0 : index
        %79 = vector.load %arg14[%c0_42, %c0_43] : memref<2x32xf32, #tpu.memory_space<vmem>>, vector<2x32xf32>
        %cst_44 = arith.constant dense<0.000000e+00> : vector<2x96xf32>
        %80 = tpu.matmul %79, %21, %cst_44 {dimension_numbers = #tpu.dot_dimension_numbers<[1], [0], [0], [1], [0, 0, 1, 1], [], []>} : vector<2x32xf32>, vector<32x96xf32>, vector<2x96xf32> -> vector<2x96xf32>
        %81 = vector.broadcast %22 : vector<1x96xf32> to vector<2x96xf32>
        %82 = arith.addf %80, %81 : vector<2x96xf32>
        %83 = vector.extract_strided_slice %18 {offsets = [0, 6, 0], sizes = [2, 1, 96], strides = [1, 1, 1]} : vector<2x8x96xf32> to vector<2x1x96xf32>
        %84 = vector.shape_cast %83 : vector<2x1x96xf32> to vector<2x96xf32>
        %85 = vector.extract_strided_slice %84 {offsets = [0, 0], sizes = [2, 32], strides = [1, 1]} : vector<2x96xf32> to vector<2x32xf32>
        %86 = vector.extract_strided_slice %82 {offsets = [0, 0], sizes = [2, 32], strides = [1, 1]} : vector<2x96xf32> to vector<2x32xf32>
        %87 = arith.addf %85, %86 : vector<2x32xf32>
        %cst_45 = arith.constant 5.000000e-01 : f32
        %88 = vector.broadcast %cst_45 : f32 to vector<2x32xf32>
        %89 = arith.mulf %88, %87 : vector<2x32xf32>
        %90 = math.tanh %89 : vector<2x32xf32>
        %cst_46 = arith.constant 1.000000e+00 : f32
        %91 = vector.broadcast %cst_46 : f32 to vector<2x32xf32>
        %92 = arith.addf %90, %91 : vector<2x32xf32>
        %cst_47 = arith.constant 5.000000e-01 : f32
        %93 = vector.broadcast %cst_47 : f32 to vector<2x32xf32>
        %94 = arith.mulf %93, %92 : vector<2x32xf32>
        %95 = vector.extract_strided_slice %84 {offsets = [0, 32], sizes = [2, 32], strides = [1, 1]} : vector<2x96xf32> to vector<2x32xf32>
        %96 = vector.extract_strided_slice %82 {offsets = [0, 32], sizes = [2, 32], strides = [1, 1]} : vector<2x96xf32> to vector<2x32xf32>
        %97 = arith.addf %95, %96 : vector<2x32xf32>
        %cst_48 = arith.constant 5.000000e-01 : f32
        %98 = vector.broadcast %cst_48 : f32 to vector<2x32xf32>
        %99 = arith.mulf %98, %97 : vector<2x32xf32>
        %100 = math.tanh %99 : vector<2x32xf32>
        %cst_49 = arith.constant 1.000000e+00 : f32
        %101 = vector.broadcast %cst_49 : f32 to vector<2x32xf32>
        %102 = arith.addf %100, %101 : vector<2x32xf32>
        %cst_50 = arith.constant 5.000000e-01 : f32
        %103 = vector.broadcast %cst_50 : f32 to vector<2x32xf32>
        %104 = arith.mulf %103, %102 : vector<2x32xf32>
        %105 = vector.extract_strided_slice %84 {offsets = [0, 64], sizes = [2, 32], strides = [1, 1]} : vector<2x96xf32> to vector<2x32xf32>
        %106 = vector.extract_strided_slice %82 {offsets = [0, 64], sizes = [2, 32], strides = [1, 1]} : vector<2x96xf32> to vector<2x32xf32>
        %107 = arith.mulf %94, %106 : vector<2x32xf32>
        %108 = arith.addf %105, %107 : vector<2x32xf32>
        %109 = math.tanh %108 : vector<2x32xf32>
        %cst_51 = arith.constant 1.000000e+00 : f32
        %110 = vector.broadcast %cst_51 : f32 to vector<2x32xf32>
        %111 = arith.subf %110, %104 : vector<2x32xf32>
        %112 = arith.mulf %111, %109 : vector<2x32xf32>
        %113 = arith.mulf %104, %79 : vector<2x32xf32>
        %114 = arith.addf %112, %113 : vector<2x32xf32>
        %115 = vector.extract_strided_slice %20 {offsets = [0, 6], sizes = [2, 1], strides = [1, 1]} : vector<2x8xf32> to vector<2x1xf32>
        %116 = vector.broadcast %115 : vector<2x1xf32> to vector<2x32xf32>
        %117 = arith.mulf %116, %114 : vector<2x32xf32>
        %cst_52 = arith.constant 1.000000e+00 : f32
        %118 = vector.broadcast %cst_52 : f32 to vector<2x1xf32>
        %119 = arith.subf %118, %115 : vector<2x1xf32>
        %120 = vector.broadcast %119 : vector<2x1xf32> to vector<2x32xf32>
        %121 = arith.mulf %120, %79 : vector<2x32xf32>
        %122 = arith.addf %117, %121 : vector<2x32xf32>
        %c0_53 = arith.constant 0 : index
        %c0_54 = arith.constant 0 : index
        %123 = vector.load %arg14[%c0_53, %c0_54] : memref<2x32xf32, #tpu.memory_space<vmem>>, vector<2x32xf32>
        tpu.vector_store %arg14[%c0_53, %c0_54], %122 {strides = array<i32>} : memref<2x32xf32, #tpu.memory_space<vmem>>, vector<2x32xf32>,
      } else {
      }
      %c8_i32_39 = arith.constant 8 : i32
      %72 = arith.muli %arg1, %c8_i32_39 : i32
      %c7_i32 = arith.constant 7 : i32
      %73 = arith.addi %72, %c7_i32 : i32
      %74 = arith.index_cast %73 : i32 to index
      %75 = memref.load %arg4[%74] : memref<8xi32, #tpu.memory_space<smem>>
      %c0_i32_40 = arith.constant 0 : i32
      %76 = arith.cmpi ne, %75, %c0_i32_40 : i32
      %77 = arith.extui %76 : i1 to i32
      %c0_i32_41 = arith.constant 0 : i32
      %78 = arith.cmpi ne, %77, %c0_i32_41 : i32
      scf.if %78 {
        %c0_42 = arith.constant 0 : index
        %c0_43 = arith.constant 0 : index
        %79 = vector.load %arg14[%c0_42, %c0_43] : memref<2x32xf32, #tpu.memory_space<vmem>>, vector<2x32xf32>
        %cst_44 = arith.constant dense<0.000000e+00> : vector<2x96xf32>
        %80 = tpu.matmul %79, %21, %cst_44 {dimension_numbers = #tpu.dot_dimension_numbers<[1], [0], [0], [1], [0, 0, 1, 1], [], []>} : vector<2x32xf32>, vector<32x96xf32>, vector<2x96xf32> -> vector<2x96xf32>
        %81 = vector.broadcast %22 : vector<1x96xf32> to vector<2x96xf32>
        %82 = arith.addf %80, %81 : vector<2x96xf32>
        %83 = vector.extract_strided_slice %18 {offsets = [0, 7, 0], sizes = [2, 1, 96], strides = [1, 1, 1]} : vector<2x8x96xf32> to vector<2x1x96xf32>
        %84 = vector.shape_cast %83 : vector<2x1x96xf32> to vector<2x96xf32>
        %85 = vector.extract_strided_slice %84 {offsets = [0, 0], sizes = [2, 32], strides = [1, 1]} : vector<2x96xf32> to vector<2x32xf32>
        %86 = vector.extract_strided_slice %82 {offsets = [0, 0], sizes = [2, 32], strides = [1, 1]} : vector<2x96xf32> to vector<2x32xf32>
        %87 = arith.addf %85, %86 : vector<2x32xf32>
        %cst_45 = arith.constant 5.000000e-01 : f32
        %88 = vector.broadcast %cst_45 : f32 to vector<2x32xf32>
        %89 = arith.mulf %88, %87 : vector<2x32xf32>
        %90 = math.tanh %89 : vector<2x32xf32>
        %cst_46 = arith.constant 1.000000e+00 : f32
        %91 = vector.broadcast %cst_46 : f32 to vector<2x32xf32>
        %92 = arith.addf %90, %91 : vector<2x32xf32>
        %cst_47 = arith.constant 5.000000e-01 : f32
        %93 = vector.broadcast %cst_47 : f32 to vector<2x32xf32>
        %94 = arith.mulf %93, %92 : vector<2x32xf32>
        %95 = vector.extract_strided_slice %84 {offsets = [0, 32], sizes = [2, 32], strides = [1, 1]} : vector<2x96xf32> to vector<2x32xf32>
        %96 = vector.extract_strided_slice %82 {offsets = [0, 32], sizes = [2, 32], strides = [1, 1]} : vector<2x96xf32> to vector<2x32xf32>
        %97 = arith.addf %95, %96 : vector<2x32xf32>
        %cst_48 = arith.constant 5.000000e-01 : f32
        %98 = vector.broadcast %cst_48 : f32 to vector<2x32xf32>
        %99 = arith.mulf %98, %97 : vector<2x32xf32>
        %100 = math.tanh %99 : vector<2x32xf32>
        %cst_49 = arith.constant 1.000000e+00 : f32
        %101 = vector.broadcast %cst_49 : f32 to vector<2x32xf32>
        %102 = arith.addf %100, %101 : vector<2x32xf32>
        %cst_50 = arith.constant 5.000000e-01 : f32
        %103 = vector.broadcast %cst_50 : f32 to vector<2x32xf32>
        %104 = arith.mulf %103, %102 : vector<2x32xf32>
        %105 = vector.extract_strided_slice %84 {offsets = [0, 64], sizes = [2, 32], strides = [1, 1]} : vector<2x96xf32> to vector<2x32xf32>
        %106 = vector.extract_strided_slice %82 {offsets = [0, 64], sizes = [2, 32], strides = [1, 1]} : vector<2x96xf32> to vector<2x32xf32>
        %107 = arith.mulf %94, %106 : vector<2x32xf32>
        %108 = arith.addf %105, %107 : vector<2x32xf32>
        %109 = math.tanh %108 : vector<2x32xf32>
        %cst_51 = arith.constant 1.000000e+00 : f32
        %110 = vector.broadcast %cst_51 : f32 to vector<2x32xf32>
        %111 = arith.subf %110, %104 : vector<2x32xf32>
        %112 = arith.mulf %111, %109 : vector<2x32xf32>
        %113 = arith.mulf %104, %79 : vector<2x32xf32>
        %114 = arith.addf %112, %113 : vector<2x32xf32>
        %115 = vector.extract_strided_slice %20 {offsets = [0, 7], sizes = [2, 1], strides = [1, 1]} : vector<2x8xf32> to vector<2x1xf32>
        %116 = vector.broadcast %115 : vector<2x1xf32> to vector<2x32xf32>
        %117 = arith.mulf %116, %114 : vector<2x32xf32>
        %cst_52 = arith.constant 1.000000e+00 : f32
        %118 = vector.broadcast %cst_52 : f32 to vector<2x1xf32>
        %119 = arith.subf %118, %115 : vector<2x1xf32>
        %120 = vector.broadcast %119 : vector<2x1xf32> to vector<2x32xf32>
        %121 = arith.mulf %120, %79 : vector<2x32xf32>
        %122 = arith.addf %117, %121 : vector<2x32xf32>
        %c0_53 = arith.constant 0 : index
        %c0_54 = arith.constant 0 : index
        %123 = vector.load %arg14[%c0_53, %c0_54] : memref<2x32xf32, #tpu.memory_space<vmem>>, vector<2x32xf32>
        tpu.vector_store %arg14[%c0_53, %c0_54], %122 {strides = array<i32>} : memref<2x32xf32, #tpu.memory_space<vmem>>, vector<2x32xf32>,
      } else {
      }
    } else {
    }
    %c0_i32_3 = arith.constant 0 : i32
    %8 = arith.cmpi eq, %arg1, %c0_i32_3 : i32
    %9 = arith.extui %8 : i1 to i32
    %c0_i32_4 = arith.constant 0 : i32
    %10 = arith.cmpi ne, %9, %c0_i32_4 : i32
    scf.if %10 {
      %c0 = arith.constant 0 : index
      %c0_5 = arith.constant 0 : index
      %11 = vector.load %arg14[%c0, %c0_5] : memref<2x32xf32, #tpu.memory_space<vmem>>, vector<2x32xf32>
      %c0_6 = arith.constant 0 : index
      %c0_7 = arith.constant 0 : index
      %12 = vector.load %arg11[%c0_6, %c0_7] : memref<32x2xf32, #tpu.memory_space<vmem>>, vector<32x2xf32>
      %cst = arith.constant dense<0.000000e+00> : vector<2x2xf32>
      %13 = tpu.matmul %11, %12, %cst {dimension_numbers = #tpu.dot_dimension_numbers<[1], [0], [0], [1], [0, 0, 1, 1], [], []>} : vector<2x32xf32>, vector<32x2xf32>, vector<2x2xf32> -> vector<2x2xf32>
      %c0_8 = arith.constant 0 : index
      %c0_9 = arith.constant 0 : index
      %14 = vector.load %arg12[%c0_8, %c0_9] : memref<1x2xf32, #tpu.memory_space<vmem>>, vector<1x2xf32>
      %15 = vector.broadcast %14 : vector<1x2xf32> to vector<2x2xf32>
      %16 = arith.addf %13, %15 : vector<2x2xf32>
      %cst_10 = arith.constant dense<0xFF800000> : vector<2xf32>
      %17 = vector.multi_reduction <maximumf>, %16, %cst_10 [1] : vector<2x2xf32> to vector<2xf32>
      %18 = vector.shape_cast %17 : vector<2xf32> to vector<2x1xf32>
      %19 = vector.broadcast %18 : vector<2x1xf32> to vector<2x2xf32>
      %20 = arith.subf %16, %19 : vector<2x2xf32>
      %21 = math.exp %20 : vector<2x2xf32>
      %cst_11 = arith.constant dense<0.000000e+00> : vector<2xf32>
      %22 = vector.multi_reduction <add>, %21, %cst_11 [1] : vector<2x2xf32> to vector<2xf32>
      %23 = vector.shape_cast %22 : vector<2xf32> to vector<2x1xf32>
      %24 = vector.broadcast %23 : vector<2x1xf32> to vector<2x2xf32>
      %25 = arith.divf %21, %24 : vector<2x2xf32>
      %c0_12 = arith.constant 0 : index
      %c0_13 = arith.constant 0 : index
      %26 = vector.load %arg13[%c0_12, %c0_13] : memref<2x2xf32, #tpu.memory_space<vmem>>, vector<2x2xf32>
      tpu.vector_store %arg13[%c0_12, %c0_13], %25 {strides = array<i32>} : memref<2x2xf32, #tpu.memory_space<vmem>>, vector<2x2xf32>,
    } else {
    }
    return
  }
  func.func @transform_0(%arg0: i32, %arg1: i32, %arg2: memref<1xi32, #tpu.memory_space<smem>>, %arg3: memref<1xi32, #tpu.memory_space<smem>>, %arg4: memref<8xi32, #tpu.memory_space<smem>>) -> (i32, i32, i32) {
    %0 = arith.index_cast %arg1 : i32 to index
    %1 = memref.load %arg3[%0] : memref<1xi32, #tpu.memory_space<smem>>
    %c0_i32 = arith.constant 0 : i32
    %c0_i32_0 = arith.constant 0 : i32
    return %arg0, %1, %c0_i32 : i32, i32, i32
  }
  func.func @transform_1(%arg0: i32, %arg1: i32, %arg2: memref<1xi32, #tpu.memory_space<smem>>, %arg3: memref<1xi32, #tpu.memory_space<smem>>, %arg4: memref<8xi32, #tpu.memory_space<smem>>) -> (i32, i32, i32) {
    %c0_i32 = arith.constant 0 : i32
    %c0_i32_0 = arith.constant 0 : i32
    return %arg1, %arg0, %c0_i32 : i32, i32, i32
  }
  func.func @transform_2(%arg0: i32, %arg1: i32, %arg2: memref<1xi32, #tpu.memory_space<smem>>, %arg3: memref<1xi32, #tpu.memory_space<smem>>, %arg4: memref<8xi32, #tpu.memory_space<smem>>) -> (i32, i32) {
    %c0_i32 = arith.constant 0 : i32
    %c0_i32_0 = arith.constant 0 : i32
    %c0_i32_1 = arith.constant 0 : i32
    return %c0_i32, %c0_i32_0 : i32, i32
  }
  func.func @transform_3(%arg0: i32, %arg1: i32, %arg2: memref<1xi32, #tpu.memory_space<smem>>, %arg3: memref<1xi32, #tpu.memory_space<smem>>, %arg4: memref<8xi32, #tpu.memory_space<smem>>) -> (i32, i32) {
    %c0_i32 = arith.constant 0 : i32
    %c0_i32_0 = arith.constant 0 : i32
    %c0_i32_1 = arith.constant 0 : i32
    return %c0_i32, %c0_i32_0 : i32, i32
  }
  func.func @transform_4(%arg0: i32, %arg1: i32, %arg2: memref<1xi32, #tpu.memory_space<smem>>, %arg3: memref<1xi32, #tpu.memory_space<smem>>, %arg4: memref<8xi32, #tpu.memory_space<smem>>) -> (i32, i32) {
    %c0_i32 = arith.constant 0 : i32
    %c0_i32_0 = arith.constant 0 : i32
    %c0_i32_1 = arith.constant 0 : i32
    return %c0_i32, %c0_i32_0 : i32, i32
  }
  func.func @transform_5(%arg0: i32, %arg1: i32, %arg2: memref<1xi32, #tpu.memory_space<smem>>, %arg3: memref<1xi32, #tpu.memory_space<smem>>, %arg4: memref<8xi32, #tpu.memory_space<smem>>) -> (i32, i32) {
    %c0_i32 = arith.constant 0 : i32
    %c0_i32_0 = arith.constant 0 : i32
    %c0_i32_1 = arith.constant 0 : i32
    return %c0_i32, %c0_i32_0 : i32, i32
  }
  func.func @transform_6(%arg0: i32, %arg1: i32, %arg2: memref<1xi32, #tpu.memory_space<smem>>, %arg3: memref<1xi32, #tpu.memory_space<smem>>, %arg4: memref<8xi32, #tpu.memory_space<smem>>) -> (i32, i32) {
    %c0_i32 = arith.constant 0 : i32
    %c0_i32_0 = arith.constant 0 : i32
    %c0_i32_1 = arith.constant 0 : i32
    return %c0_i32, %c0_i32_0 : i32, i32
  }
  func.func @transform_7(%arg0: i32, %arg1: i32, %arg2: memref<1xi32, #tpu.memory_space<smem>>, %arg3: memref<1xi32, #tpu.memory_space<smem>>, %arg4: memref<8xi32, #tpu.memory_space<smem>>) -> (i32, i32) {
    %c0_i32 = arith.constant 0 : i32
    %c0_i32_0 = arith.constant 0 : i32
    %c0_i32_1 = arith.constant 0 : i32
    return %c0_i32, %c0_i32_0 : i32, i32
  }
  func.func @transform_8(%arg0: i32, %arg1: i32, %arg2: memref<1xi32, #tpu.memory_space<smem>>, %arg3: memref<1xi32, #tpu.memory_space<smem>>, %arg4: memref<8xi32, #tpu.memory_space<smem>>) -> (i32, i32) {
    %c0_i32 = arith.constant 0 : i32
    %c0_i32_0 = arith.constant 0 : i32
    return %arg0, %c0_i32 : i32, i32
  }
}

</mosaic_0001>

<bundles_post_ra>
// kernel: tpu_custom_call.1
= control target key start
LH: loop header
LB: loop body
LE: loop exit
PB: predicated region body
PF: predicated region fallthrough
CT: control target
= control target key end

     0   :  { %s1405_s20 = smov [#allocation6]   ;;  %s1738_s0 = inlined_call_operand.<no memory space> [shape: s32[1], index: 0, kind: input, shape index: {}]   ;;  %s1739_s1 = inlined_call_operand.<no memory space> [shape: s32[1], index: 1, kind: input, shape index: {}]   ;;  %s1740_s2 = inlined_call_operand.vmem [shape: s32[8], index: 2, kind: input, shape index: {}]   ;;  %s1741_s3 = inlined_call_operand.hbm [shape: f32[2,8,32], index: 3, kind: input, shape index: {}]   ;;  %s1742_s4 = inlined_call_operand.vmem [shape: f32[1,2,8], index: 4, kind: input, shape index: {}]   ;;  %s1743_s5 = inlined_call_operand.vmem [shape: f32[32,96], index: 5, kind: input, shape index: {}]   ;;  %s1744_s6 = inlined_call_operand.hbm [shape: f32[32,96], index: 6, kind: input, shape index: {}]   ;;  %s1745_s7 = inlined_call_operand.vmem [shape: f32[1,96], index: 7, kind: input, shape index: {}]   ;;  %s1746_s8 = inlined_call_operand.vmem [shape: f32[1,96], index: 8, kind: input, shape index: {}]   ;;  %s1747_s9 = inlined_call_operand.vmem [shape: f32[32,2], index: 9, kind: input, shape index: {}]   ;;  %s1748_s10 = inlined_call_operand.vmem [shape: f32[1,2], index: 10, kind: input, shape index: {}]   ;;  %s1749_s11 = inlined_call_operand.hbm [shape: f32[2,2], index: 11, kind: output, shape index: {}]  }
   0x1   :  { %s19_s19 = sshll.u32 %s1740_s2, 4  ;;  %s20_s19 = int_to_ptr.vmem [resolvable:$true] %s19_s19 }
   0x2   :  { %22 = dma.vmem_to_smem %s20_s19, 16, %s1405_s20, [#allocation3] }
   0x3   :  { %1397 = dma.done.wait [#allocation3], 16 }
   0x4   :  { %1398 = vsyncadd [#allocation3], 4294967280 }
   0x5   :  { %25 = sfence }
   0x6   :  { %26 = vsyncpa [#allocation8], 0 }
   0x7   :  { %27 = vsyncpa [#allocation11], 0 }
   0x8   :  { %28 = vsyncpa [#allocation9], 0  ;;  %s1148_s23 = sshll.u32 %s1739_s1, 3  ;;  %s1406_s27 = smov [#allocation7]  }
   0x9   :  { %s35_s26 = scalar_lea.hbm %s1741_s3, %s1148_s23  ;;  %s38_s28 = sshll.u32 %s1406_s27, 4  ;;  %s39_s28 = int_to_ptr.vmem [resolvable:$true] %s38_s28 }
   0xa   :  { %s36_s2 = sshll.u32 %s35_s26, 4  ;;  %s53_s12 = sshll.u32 %s1744_s6, 4  ;;  %s37_s2 = int_to_ptr.hbm [resolvable:$true] %s36_s2  ;;  %s54_s12 = int_to_ptr.hbm [resolvable:$true] %s53_s12 }
   0xb   :  { %s1325_s13 = sshra.s32 %s37_s2, 4  ;;  %s1329_s1 = scalar_lea.hbm %s1741_s3, 16  ;;  %s1326_s13 = int_to_ptr.hbm [resolvable:$true] %s1325_s13 }
   0xc   :  { %s1327_s14 = scalar_lea.hbm %s1326_s13, 16  ;;  %p1330_p1 = scmp.lt.s32.totalorder %s1326_s13, %s1741_s3 }
   0xd   :  { %p1328_p0 = scmp.ne.s32.totalorder %s1326_s13, %s1327_s14  ;;  %p1331_p2 = scmp.lt.s32.totalorder %s1329_s1, %s1327_s14 }
   0xf   :  { %p1332_p3 = por %p1331_p2, %p1330_p1 }
  0x11   :  { %p1333_p4 = pnand %p1332_p3, %p1328_p0 }
  0x13   :  { %1336 = shalt.err (!%p1333_p4)
}
  0x14   :  { %s1407_s19 = smov 128   ;;  %s1408_s20 = smov 8  }
  0x15   :  { %44 = dma.hbm_to_vmem [thread:$0]  %s37_s2, 256, %s39_s28, [#allocation8], %s1407_s19, %s1407_s19, %s1408_s20  }
  0x16   :  { %s1409_s6 = smov [#allocation10]  }
  0x17   :  { %s55_s21 = sshll.u32 %s1409_s6, 4  ;;  %s56_s21 = int_to_ptr.vmem [resolvable:$true] %s55_s21 }
  0x18   :  { %61 = dma.hbm_to_vmem [thread:$0]  %s54_s12, 512, %s56_s21, [#allocation11], %s1407_s19, %s1407_s19, %s1408_s20  }
  0x19   :  { %1399 = dma.done.wait [#allocation8], 256  }
  0x1a   :  { %1400 = vsyncadd [#allocation8], 4294967040 }
  0x1b   :  { %1401 = dma.done.wait [#allocation11], 512  }
  0x1c   :  { %1402 = vsyncadd [#allocation11], 4294966784  ;;  %vm83_vm0 = vcmask 254976   ;;  %v1410_v0 = vmov 0.0   ;;  %p1149_p5 = scmp.eq.s32.totalorder %s1738_s0, 0 }
  0x1d   :  { %84 = vst.msk [vmem:[#allocation2] sm:$0x3] %vm83_vm0, %v1410_v0  ;;  %s137_s0 = sld [smem:[#allocation6]] (!%p1149_p5) }
  0x1e   :  { %89 = sbr.rel (%p1149_p5) target bundleno = 5137 (0x1411), region = 49 }
  0x23   :  { %v95_v1 = vld [vmem:[%s1743_s5 + $0x18] sm:$0xff]  ;;  %v94_v2 = vld [vmem:[%s1743_s5 + $0x10] sm:$0xff]  ;;  %v93_v3 = vld [vmem:[%s1743_s5 + $0x8] sm:$0xff]  ;;  %vm100_vm1 = vcmask 261120   ;;  %p1152_p6 = scmp.eq.s32.totalorder %s137_s0, 0 }
  0x24   :  { %119 = vmatpush.msra.mxu0 %v95_v1  ;;  %1176 = vmatpush.msra.mxu1 %v95_v1  ;;  %v92_v4 = vld [vmem:[%s1743_s5] sm:$0xff]  ;;  %v91_v6 = vld [vmem:[#allocation7 + $0x8] sm:$0xff]  ;;  %v1545_v8 = vld [vmem:[#allocation10] sm:$0xff] }
  0x25   :  { %v90_v5 = vld [vmem:[#allocation7] sm:$0xff]  ;;  %v1543_v7 = vld [vmem:[%s1742_s4] sm:$0x3]  ;;  %v1551_v11 = vld [vmem:[#allocation10 + $0x18] sm:$0xff]  ;;  %s1411_s4 = smov (!%p1152_p6), 64  }
  0x26   :  { %120 = vmatpush.msra.mxu0 %v94_v2  ;;  %1177 = vmatpush.msra.mxu1 %v94_v2  ;;  %v1547_v9 = vld [vmem:[#allocation10 + $0x8] sm:$0xff]  ;;  %v1549_v10 = vld [vmem:[#allocation10 + $0x10] sm:$0xff] }
  0x27   :  { %v1556_v12 = vld [vmem:[%s1746_s8] sm:$0x1]  ;;  %s1413_s8 = smov (!%p1152_p6), 96  }
  0x28   :  { %121 = vmatpush.msra.mxu0 %v93_v3  ;;  %1178 = vmatpush.msra.mxu1 %v93_v3  ;;  %v1219_v13 = vld [vmem:[%s1745_s7] ss:$0 sm:$0xff]  ;;  %s1412_s7 = smov (!%p1152_p6), 32  }
  0x2a   :  { %122 = vmatpush.msra.mxu0 %v92_v4  ;;  %1179 = vmatpush.msra.mxu1 %v92_v4 }
  0x2b   :  { %1150 = vmatmul.msk.f32.vlgmr.msra.gmra.mxu0 %vm100_vm1, %v90_v5  ;;  %1151 = vmatmul.msk.f32.vlgmr.msra.gmra.mxu1 %vm100_vm1, %v91_v6 }
  0xa5   :  { %141 = sbr.rel (%p1152_p6) target bundleno = 796 (0x31c), region = 53 }
  0xa8   :  { %v124_v14 = vpop.f32.mrf.mxu0  ;;  %v127_v15 = vpop.f32.mrf.mxu1 }
  0xa9   :  { %v1561_v16 = vadd.f32 %v1219_v13, %v124_v14  ;;  %v1563_v17 = vadd.f32 %v1219_v13, %v127_v15 }
  0xaa   :  { %161 = vmatpush.msra.mxu0 %v1551_v11  ;;  %v1568_v18 = vld [vmem:[#allocation2] sm:$0x3]  ;;  %v144_v19 = vperm.slane %v1556_v12, 0  ;;  %v240_v44 = vsub.f32 1.0, %v1543_v7  ;;  %v1414_v45 = vmov 0   ;;  %vm234_vm2 = vcmask 1041409  }
  0xab   :  { %v215_v42 = vrot.slane %v1568_v18, 1  ;;  %1221 = vset.pattern.permute.xlu1 %v1414_v45  ;;  %1220 = vset.pattern.permute.xlu2 %v1414_v45 }
  0xac   :  { %162 = vmatpush.msra.mxu0 %v1549_v10  ;;  %1222 = vset.pattern.permute.xlu0 %v1414_v45 }
  0xae   :  { %163 = vmatpush.msra.mxu0 %v1547_v9 }
  0xb0   :  { %164 = vmatpush.msra.mxu0 %v1545_v8 }
  0xb1   :  { %1153 = vmatmul.msk.f32.vlgmr.msra.gmra.mxu0 %vm100_vm1, %v1568_v18 }
 0x12e   :  { %v166_v20 = vpop.f32.mrf.mxu0 }
 0x12f   :  { %v167_v21 = vadd.f32 %v166_v20, %v144_v19 }
 0x131   :  { %v170_v22 = vrot.slane %v167_v21, 1  ;;  %v173_v25 = vadd.f32 %v167_v21, %v1561_v16 }
 0x133   :  { %185 = vrot.lane.b32.xlu0 %v170_v22, %s1411_s4  ;;  %v174_v23 = vadd.f32 %v170_v22, %v1563_v17  ;;  %v175_v26 = vmul.f32 0.5, %v173_v25 }
 0x135   :  { %v176_v24 = vmul.f32 0.5, %v174_v23 }
 0x137   :  { %1223 = vtanh.f32 %v176_v24 }
 0x138   :  { %1225 = vtanh.f32 %v175_v26 }
 0x13b   :  { %183 = vrot.lane.b32.xlu0 %v167_v21, %s1411_s4 }
 0x13d   :  { %v1224_v27 = vpop.eup %1223 }
 0x13e   :  { %v180_v28 = vadd.f32 1.0, %v1224_v27  ;;  %v1226_v30 = vpop.eup %1225 }
 0x13f   :  { %v179_v33 = vadd.f32 1.0, %v1226_v30 }
 0x140   :  { %v182_v29 = vmul.f32 0.5, %v180_v28 }
 0x141   :  { %v181_v34 = vmul.f32 0.5, %v179_v33 }
 0x142   :  { %v204_v48 = vsub.f32 1.0, %v182_v29 }
 0x143   :  { %v203_v53 = vsub.f32 1.0, %v181_v34 }
 0x1a5   :  { %v186_v31 = vpop.permute.xlu0 %185 }
 0x1a6   :  { %v190_v32 = vmul.f32 %v186_v31, %v182_v29 }
 0x1a8   :  { %195 = vrot.lane.b32.xlu1 %v190_v32, %s1411_s4 }
 0x1ad   :  { %v184_v35 = vpop.permute.xlu0 %183 }
 0x1ae   :  { %v189_v36 = vmul.f32 %v184_v35, %v181_v34 }
 0x1b0   :  { %193 = vrot.lane.b32.xlu1 %v189_v36, %s1411_s4 }
 0x1b8   :  { %216 = vrot.lane.b32.xlu1 %v1568_v18, %s1412_s7 }
 0x1c0   :  { %243 = vperm.xlu1 %1221, %v240_v44  }
 0x21a   :  { %v196_v37 = vpop.permute.xlu1 %195 }
 0x21b   :  { %v200_v38 = vadd.f32 %v196_v37, %v1563_v17 }
 0x21d   :  { %1227 = vtanh.f32 %v200_v38 }
 0x222   :  { %v194_v39 = vpop.permute.xlu1 %193 }
 0x223   :  { %v1228_v40 = vpop.eup %1227  ;;  %v199_v41 = vadd.f32 %v194_v39, %v1561_v16 }
 0x224   :  { %209 = vrot.lane.b32.xlu2 %v1228_v40, %s1413_s8 }
 0x225   :  { %1229 = vtanh.f32 %v199_v41 }
 0x22a   :  { %v217_v51 = vpop.permute.xlu1 %216 }
 0x22b   :  { %v1230_v43 = vpop.eup %1229  ;;  %v222_v55 = vmul.f32 %v217_v51, %v181_v34 }
 0x22c   :  { %218 = vrot.lane.b32.xlu2 %v215_v42, %s1412_s7  ;;  %207 = vrot.lane.b32.xlu0 %v1230_v43, %s1413_s8 }
 0x232   :  { %v244_v60 = vpop.permute.xlu1 %243 }
 0x233   :  { %v246_v62 = vmul.f32 %v244_v60, %v1568_v18 }
 0x234   :  { %228 = vperm.xlu2 %1220, %v1543_v7  }
 0x27e   :  { %v210_v46 = vpop.permute.xlu2 %209 }
 0x27f   :  { %v214_v50 = vmul.f32 %v210_v46, %v204_v48 }
 0x286   :  { %v219_v47 = vpop.permute.xlu2 %218 }
 0x287   :  { %v223_v49 = vmul.f32 %v219_v47, %v182_v29 }
 0x289   :  { %v225_v52 = vadd.f32 %v223_v49, %v214_v50 }
 0x28b   :  { %v233_v57 = vrot.slane %v225_v52, 7 }
 0x28e   :  { %v229_v61 = vpop.permute.xlu2 %228 }
 0x29e   :  { %v208_v54 = vpop.permute.xlu0 %207 }
 0x29f   :  { %v213_v56 = vmul.f32 %v208_v54, %v203_v53 }
 0x2a1   :  { %v224_v58 = vadd.f32 %v222_v55, %v213_v56 }
 0x2a3   :  { %v235_v59 = vsel %vm234_vm2, %v233_v57, %v224_v58 }
 0x2a4   :  { %236 = vrot.lane.b32.xlu0 %v235_v59, %s1413_s8 }
 0x316   :  { %v237_v63 = vpop.permute.xlu0 %236 }
 0x317   :  { %v239_v0 = vmul.f32 %v237_v63, %v229_v61 }
 0x319   :  { %v247_v1 = vadd.f32 %v246_v62, %v239_v0 }
 0x31b   :  { %249 = vst.msk [vmem:[#allocation2] sm:$0x3] %vm83_vm0, %v247_v1 }
 0x31c PF:  { %s1154_s16 = sld [smem:[#allocation6 + $0x1]] }
 0x322   :  { %p1155_p7 = scmp.eq.s32.totalorder %s1154_s16, 0 }
 0x323   :  { %s1415_s1 = smov (!%p1155_p7), 64   ;;  %s1416_s17 = smov (!%p1155_p7), 32  }
 0x324   :  { %255 = sbr.rel (%p1155_p7) target bundleno = 1435 (0x59b), region = 57  ;;  %s1417_s18 = smov (!%p1155_p7), 96  }
 0x329   :  { %275 = vmatpush.msra.mxu0 %v1551_v11  ;;  %v1587_v2 = vld [vmem:[#allocation2] sm:$0x3]  ;;  %v258_v3 = vperm.slane %v1556_v12, 0  ;;  %v354_v36 = vsub.f32 1.0, %v1543_v7  ;;  %v1418_v37 = vmov 1   ;;  %vm348_vm3 = vcmask 1041409  }
 0x32a   :  { %v329_v34 = vrot.slane %v1587_v2, 7  ;;  %1232 = vset.pattern.permute.xlu1 %v1418_v37  ;;  %1231 = vset.pattern.permute.xlu2 %v1418_v37 }
 0x32b   :  { %276 = vmatpush.msra.mxu0 %v1549_v10  ;;  %1233 = vset.pattern.permute.xlu0 %v1418_v37 }
 0x32d   :  { %277 = vmatpush.msra.mxu0 %v1547_v9 }
 0x32f   :  { %278 = vmatpush.msra.mxu0 %v1545_v8 }
 0x330   :  { %1156 = vmatmul.msk.f32.vlgmr.msra.gmra.mxu0 %vm100_vm1, %v1587_v2 }
 0x3ad   :  { %v280_v4 = vpop.f32.mrf.mxu0 }
 0x3ae   :  { %v281_v5 = vadd.f32 %v280_v4, %v258_v3 }
 0x3b0   :  { %v284_v6 = vrot.slane %v281_v5, 7  ;;  %v288_v15 = vadd.f32 %v281_v5, %v1563_v17 }
 0x3b2   :  { %297 = vrot.lane.b32.xlu0 %v284_v6, %s1415_s1  ;;  %v287_v13 = vadd.f32 %v284_v6, %v1561_v16  ;;  %v290_v18 = vmul.f32 0.5, %v288_v15 }
 0x3b4   :  { %v289_v14 = vmul.f32 0.5, %v287_v13 }
 0x3b6   :  { %1234 = vtanh.f32 %v289_v14 }
 0x3b7   :  { %1236 = vtanh.f32 %v290_v18 }
 0x3ba   :  { %299 = vrot.lane.b32.xlu0 %v281_v5, %s1415_s1 }
 0x3bc   :  { %v1235_v19 = vpop.eup %1234 }
 0x3bd   :  { %v293_v20 = vadd.f32 1.0, %v1235_v19  ;;  %v1237_v22 = vpop.eup %1236 }
 0x3be   :  { %v294_v25 = vadd.f32 1.0, %v1237_v22 }
 0x3bf   :  { %v295_v21 = vmul.f32 0.5, %v293_v20 }
 0x3c0   :  { %v296_v26 = vmul.f32 0.5, %v294_v25 }
 0x3c1   :  { %v317_v40 = vsub.f32 1.0, %v295_v21 }
 0x3c2   :  { %v318_v45 = vsub.f32 1.0, %v296_v26 }
 0x424   :  { %v298_v23 = vpop.permute.xlu0 %297 }
 0x425   :  { %v303_v24 = vmul.f32 %v298_v23, %v295_v21 }
 0x427   :  { %307 = vrot.lane.b32.xlu1 %v303_v24, %s1415_s1 }
 0x42c   :  { %v300_v27 = vpop.permute.xlu0 %299 }
 0x42d   :  { %v304_v28 = vmul.f32 %v300_v27, %v296_v26 }
 0x42f   :  { %309 = vrot.lane.b32.xlu1 %v304_v28, %s1415_s1 }
 0x437   :  { %332 = vrot.lane.b32.xlu1 %v1587_v2, %s1416_s17 }
 0x43f   :  { %357 = vperm.xlu1 %1232, %v354_v36  }
 0x499   :  { %v308_v29 = vpop.permute.xlu1 %307 }
 0x49a   :  { %v313_v30 = vadd.f32 %v308_v29, %v1561_v16 }
 0x49c   :  { %1238 = vtanh.f32 %v313_v30 }
 0x4a1   :  { %v310_v31 = vpop.permute.xlu1 %309 }
 0x4a2   :  { %v1239_v32 = vpop.eup %1238  ;;  %v314_v33 = vadd.f32 %v310_v31, %v1563_v17 }
 0x4a3   :  { %321 = vrot.lane.b32.xlu2 %v1239_v32, %s1417_s18 }
 0x4a4   :  { %1240 = vtanh.f32 %v314_v33 }
 0x4a9   :  { %v333_v43 = vpop.permute.xlu1 %332 }
 0x4aa   :  { %v1241_v35 = vpop.eup %1240  ;;  %v337_v47 = vmul.f32 %v333_v43, %v296_v26 }
 0x4ab   :  { %330 = vrot.lane.b32.xlu2 %v329_v34, %s1416_s17  ;;  %323 = vrot.lane.b32.xlu0 %v1241_v35, %s1417_s18 }
 0x4b1   :  { %v358_v52 = vpop.permute.xlu1 %357 }
 0x4b2   :  { %v360_v54 = vmul.f32 %v358_v52, %v1587_v2 }
 0x4b3   :  { %342 = vperm.xlu2 %1231, %v1543_v7  }
 0x4fd   :  { %v322_v38 = vpop.permute.xlu2 %321 }
 0x4fe   :  { %v327_v42 = vmul.f32 %v322_v38, %v317_v40 }
 0x505   :  { %v331_v39 = vpop.permute.xlu2 %330 }
 0x506   :  { %v336_v41 = vmul.f32 %v331_v39, %v295_v21 }
 0x508   :  { %v338_v44 = vadd.f32 %v336_v41, %v327_v42 }
 0x50a   :  { %v347_v49 = vrot.slane %v338_v44, 1 }
 0x50d   :  { %v343_v53 = vpop.permute.xlu2 %342 }
 0x51d   :  { %v324_v46 = vpop.permute.xlu0 %323 }
 0x51e   :  { %v328_v48 = vmul.f32 %v324_v46, %v318_v45 }
 0x520   :  { %v339_v50 = vadd.f32 %v337_v47, %v328_v48 }
 0x522   :  { %v349_v51 = vsel %vm348_vm3, %v339_v50, %v347_v49 }
 0x523   :  { %350 = vrot.lane.b32.xlu0 %v349_v51, %s1417_s18 }
 0x595   :  { %v351_v55 = vpop.permute.xlu0 %350 }
 0x596   :  { %v353_v56 = vmul.f32 %v351_v55, %v343_v53 }
 0x598   :  { %v361_v57 = vadd.f32 %v360_v54, %v353_v56 }
 0x59a   :  { %363 = vst.msk [vmem:[#allocation2] sm:$0x3] %vm83_vm0, %v361_v57 }
 0x59b PF:  { %s1157_s19 = sld [smem:[#allocation6 + $0x2]] }
 0x5a1   :  { %p1158_p8 = scmp.eq.s32.totalorder %s1157_s19, 0 }
 0x5a2   :  { %s1419_s20 = smov (!%p1158_p8), 64   ;;  %s1420_s6 = smov (!%p1158_p8), 32  }
 0x5a3   :  { %369 = sbr.rel (%p1158_p8) target bundleno = 2052 (0x804), region = 61  ;;  %s1421_s21 = smov (!%p1158_p8), 96  }
 0x5a8   :  { %389 = vmatpush.msra.mxu0 %v1551_v11  ;;  %v1606_v58 = vld [vmem:[#allocation2] sm:$0x3]  ;;  %v372_v59 = vperm.slane %v1556_v12, 0  ;;  %v471_v30 = vsub.f32 1.0, %v1543_v7  ;;  %v1422_v31 = vmov 2   ;;  %vm465_vm4 = vcmask 1041409  }
 0x5a9   :  { %v444_v0 = vrot.slane %v1606_v58, 6  ;;  %v445_v23 = vrot.slane %v1606_v58, 7  ;;  %1243 = vset.pattern.permute.xlu1 %v1422_v31  ;;  %1242 = vset.pattern.permute.xlu2 %v1422_v31 }
 0x5aa   :  { %390 = vmatpush.msra.mxu0 %v1549_v10  ;;  %1244 = vset.pattern.permute.xlu0 %v1422_v31 }
 0x5ac   :  { %391 = vmatpush.msra.mxu0 %v1547_v9 }
 0x5ae   :  { %392 = vmatpush.msra.mxu0 %v1545_v8 }
 0x5af   :  { %1159 = vmatmul.msk.f32.vlgmr.msra.gmra.mxu0 %vm100_vm1, %v1606_v58 }
 0x62c   :  { %v394_v60 = vpop.f32.mrf.mxu0 }
 0x62d   :  { %v395_v61 = vadd.f32 %v394_v60, %v372_v59 }
 0x62f   :  { %v398_v62 = vrot.slane %v395_v61, 6  ;;  %v399_v63 = vrot.slane %v395_v61, 7 }
 0x631   :  { %412 = vrot.lane.b32.xlu0 %v398_v62, %s1419_s20  ;;  %v402_v1 = vadd.f32 %v398_v62, %v1561_v16  ;;  %v403_v3 = vadd.f32 %v399_v63, %v1563_v17 }
 0x633   :  { %v404_v2 = vmul.f32 0.5, %v402_v1  ;;  %v405_v4 = vmul.f32 0.5, %v403_v3 }
 0x635   :  { %1245 = vtanh.f32 %v404_v2 }
 0x636   :  { %1247 = vtanh.f32 %v405_v4 }
 0x639   :  { %414 = vrot.lane.b32.xlu0 %v399_v63, %s1419_s20 }
 0x63b   :  { %v1246_v5 = vpop.eup %1245 }
 0x63c   :  { %v408_v6 = vadd.f32 1.0, %v1246_v5  ;;  %v1248_v14 = vpop.eup %1247 }
 0x63d   :  { %v409_v19 = vadd.f32 1.0, %v1248_v14 }
 0x63e   :  { %v410_v13 = vmul.f32 0.5, %v408_v6 }
 0x63f   :  { %v411_v20 = vmul.f32 0.5, %v409_v19 }
 0x640   :  { %v432_v33 = vsub.f32 1.0, %v410_v13 }
 0x641   :  { %446 = vrot.lane.b32.xlu0 %v444_v0, %s1420_s6  ;;  %v433_v38 = vsub.f32 1.0, %v411_v20 }
 0x6a3   :  { %v413_v15 = vpop.permute.xlu0 %412 }
 0x6a4   :  { %v418_v18 = vmul.f32 %v413_v15, %v410_v13 }
 0x6a6   :  { %422 = vrot.lane.b32.xlu1 %v418_v18, %s1419_s20 }
 0x6ab   :  { %v415_v21 = vpop.permute.xlu0 %414 }
 0x6ac   :  { %v419_v22 = vmul.f32 %v415_v21, %v411_v20 }
 0x6ae   :  { %424 = vrot.lane.b32.xlu1 %v419_v22, %s1419_s20 }
 0x6b3   :  { %v447_v34 = vpop.permute.xlu0 %446 }
 0x6b4   :  { %v452_v37 = vmul.f32 %v447_v34, %v410_v13 }
 0x6b6   :  { %448 = vrot.lane.b32.xlu1 %v445_v23, %s1420_s6 }
 0x6be   :  { %474 = vperm.xlu1 %1243, %v471_v30  }
 0x718   :  { %v423_v24 = vpop.permute.xlu1 %422 }
 0x719   :  { %v428_v25 = vadd.f32 %v423_v24, %v1561_v16 }
 0x71b   :  { %1249 = vtanh.f32 %v428_v25 }
 0x720   :  { %v425_v26 = vpop.permute.xlu1 %424 }
 0x721   :  { %v1250_v27 = vpop.eup %1249  ;;  %v429_v28 = vadd.f32 %v425_v26, %v1563_v17 }
 0x722   :  { %436 = vrot.lane.b32.xlu2 %v1250_v27, %s1421_s21 }
 0x723   :  { %1251 = vtanh.f32 %v429_v28 }
 0x728   :  { %v449_v36 = vpop.permute.xlu1 %448 }
 0x729   :  { %v1252_v29 = vpop.eup %1251  ;;  %v453_v40 = vmul.f32 %v449_v36, %v411_v20 }
 0x72a   :  { %438 = vrot.lane.b32.xlu2 %v1252_v29, %s1421_s21 }
 0x730   :  { %v475_v47 = vpop.permute.xlu1 %474 }
 0x731   :  { %v477_v49 = vmul.f32 %v475_v47, %v1606_v58 }
 0x732   :  { %458 = vperm.xlu2 %1242, %v1543_v7  }
 0x77c   :  { %v437_v32 = vpop.permute.xlu2 %436 }
 0x77d   :  { %v442_v35 = vmul.f32 %v437_v32, %v432_v33 }
 0x77f   :  { %v454_v41 = vadd.f32 %v452_v37, %v442_v35 }
 0x781   :  { %v463_v44 = vrot.slane %v454_v41, 2 }
 0x784   :  { %v439_v39 = vpop.permute.xlu2 %438 }
 0x785   :  { %v443_v42 = vmul.f32 %v439_v39, %v433_v38 }
 0x787   :  { %v455_v43 = vadd.f32 %v453_v40, %v443_v42 }
 0x789   :  { %v464_v45 = vrot.slane %v455_v43, 1 }
 0x78b   :  { %v466_v46 = vsel %vm465_vm4, %v464_v45, %v463_v44 }
 0x78c   :  { %467 = vrot.lane.b32.xlu0 %v466_v46, %s1421_s21  ;;  %v459_v48 = vpop.permute.xlu2 %458 }
 0x7fe   :  { %v468_v50 = vpop.permute.xlu0 %467 }
 0x7ff   :  { %v470_v51 = vmul.f32 %v468_v50, %v459_v48 }
 0x801   :  { %v478_v52 = vadd.f32 %v477_v49, %v470_v51 }
 0x803   :  { %480 = vst.msk [vmem:[#allocation2] sm:$0x3] %vm83_vm0, %v478_v52 }
 0x804 PF:  { %s1160_s3 = sld [smem:[#allocation6 + $0x3]] }
 0x80a   :  { %p1161_p9 = scmp.eq.s32.totalorder %s1160_s3, 0 }
 0x80b   :  { %s1423_s22 = smov (!%p1161_p9), 64   ;;  %s1424_s23 = smov (!%p1161_p9), 32  }
 0x80c   :  { %486 = sbr.rel (%p1161_p9) target bundleno = 2669 (0xa6d), region = 65  ;;  %s1425_s24 = smov (!%p1161_p9), 96  }
 0x811   :  { %506 = vmatpush.msra.mxu0 %v1551_v11  ;;  %v1625_v53 = vld [vmem:[#allocation2] sm:$0x3]  ;;  %v489_v54 = vperm.slane %v1556_v12, 0  ;;  %v588_v25 = vsub.f32 1.0, %v1543_v7  ;;  %v1426_v26 = vmov 3   ;;  %vm582_vm5 = vcmask 1041409  }
 0x812   :  { %v561_v59 = vrot.slane %v1625_v53, 5  ;;  %v562_v18 = vrot.slane %v1625_v53, 6  ;;  %1254 = vset.pattern.permute.xlu1 %v1426_v26  ;;  %1253 = vset.pattern.permute.xlu2 %v1426_v26 }
 0x813   :  { %507 = vmatpush.msra.mxu0 %v1549_v10  ;;  %1255 = vset.pattern.permute.xlu0 %v1426_v26 }
 0x815   :  { %508 = vmatpush.msra.mxu0 %v1547_v9 }
 0x817   :  { %509 = vmatpush.msra.mxu0 %v1545_v8 }
 0x818   :  { %1162 = vmatmul.msk.f32.vlgmr.msra.gmra.mxu0 %vm100_vm1, %v1625_v53 }
 0x895   :  { %v511_v55 = vpop.f32.mrf.mxu0 }
 0x896   :  { %v512_v56 = vadd.f32 %v511_v55, %v489_v54 }
 0x898   :  { %v515_v57 = vrot.slane %v512_v56, 5  ;;  %v516_v58 = vrot.slane %v512_v56, 6 }
 0x89a   :  { %529 = vrot.lane.b32.xlu0 %v515_v57, %s1423_s22  ;;  %v519_v60 = vadd.f32 %v515_v57, %v1561_v16  ;;  %v520_v62 = vadd.f32 %v516_v58, %v1563_v17 }
 0x89c   :  { %v521_v61 = vmul.f32 0.5, %v519_v60  ;;  %v522_v63 = vmul.f32 0.5, %v520_v62 }
 0x89e   :  { %1256 = vtanh.f32 %v521_v61 }
 0x89f   :  { %1258 = vtanh.f32 %v522_v63 }
 0x8a2   :  { %531 = vrot.lane.b32.xlu0 %v516_v58, %s1423_s22 }
 0x8a4   :  { %v1257_v0 = vpop.eup %1256 }
 0x8a5   :  { %v525_v1 = vadd.f32 1.0, %v1257_v0  ;;  %v1259_v3 = vpop.eup %1258 }
 0x8a6   :  { %v526_v6 = vadd.f32 1.0, %v1259_v3 }
 0x8a7   :  { %v527_v2 = vmul.f32 0.5, %v525_v1 }
 0x8a8   :  { %v528_v13 = vmul.f32 0.5, %v526_v6 }
 0x8a9   :  { %v549_v28 = vsub.f32 1.0, %v527_v2 }
 0x8aa   :  { %563 = vrot.lane.b32.xlu0 %v561_v59, %s1424_s23  ;;  %v550_v33 = vsub.f32 1.0, %v528_v13 }
 0x90c   :  { %v530_v4 = vpop.permute.xlu0 %529 }
 0x90d   :  { %v535_v5 = vmul.f32 %v530_v4, %v527_v2 }
 0x90f   :  { %539 = vrot.lane.b32.xlu1 %v535_v5, %s1423_s22 }
 0x914   :  { %v532_v14 = vpop.permute.xlu0 %531 }
 0x915   :  { %v536_v15 = vmul.f32 %v532_v14, %v528_v13 }
 0x917   :  { %541 = vrot.lane.b32.xlu1 %v536_v15, %s1423_s22 }
 0x91c   :  { %v564_v29 = vpop.permute.xlu0 %563 }
 0x91d   :  { %v569_v32 = vmul.f32 %v564_v29, %v527_v2 }
 0x91f   :  { %565 = vrot.lane.b32.xlu1 %v562_v18, %s1424_s23 }
 0x927   :  { %591 = vperm.xlu1 %1254, %v588_v25  }
 0x981   :  { %v540_v19 = vpop.permute.xlu1 %539 }
 0x982   :  { %v545_v20 = vadd.f32 %v540_v19, %v1561_v16 }
 0x984   :  { %1260 = vtanh.f32 %v545_v20 }
 0x989   :  { %v542_v21 = vpop.permute.xlu1 %541 }
 0x98a   :  { %v1261_v22 = vpop.eup %1260  ;;  %v546_v23 = vadd.f32 %v542_v21, %v1563_v17 }
 0x98b   :  { %553 = vrot.lane.b32.xlu2 %v1261_v22, %s1425_s24 }
 0x98c   :  { %1262 = vtanh.f32 %v546_v23 }
 0x991   :  { %v566_v31 = vpop.permute.xlu1 %565 }
 0x992   :  { %v1263_v24 = vpop.eup %1262  ;;  %v570_v35 = vmul.f32 %v566_v31, %v528_v13 }
 0x993   :  { %555 = vrot.lane.b32.xlu2 %v1263_v24, %s1425_s24 }
 0x999   :  { %v592_v42 = vpop.permute.xlu1 %591 }
 0x99a   :  { %v594_v44 = vmul.f32 %v592_v42, %v1625_v53 }
 0x99b   :  { %575 = vperm.xlu2 %1253, %v1543_v7  }
 0x9e5   :  { %v554_v27 = vpop.permute.xlu2 %553 }
 0x9e6   :  { %v559_v30 = vmul.f32 %v554_v27, %v549_v28 }
 0x9e8   :  { %v571_v36 = vadd.f32 %v569_v32, %v559_v30 }
 0x9ea   :  { %v580_v39 = vrot.slane %v571_v36, 3 }
 0x9ed   :  { %v556_v34 = vpop.permute.xlu2 %555 }
 0x9ee   :  { %v560_v37 = vmul.f32 %v556_v34, %v550_v33 }
 0x9f0   :  { %v572_v38 = vadd.f32 %v570_v35, %v560_v37 }
 0x9f2   :  { %v581_v40 = vrot.slane %v572_v38, 2 }
 0x9f4   :  { %v583_v41 = vsel %vm582_vm5, %v581_v40, %v580_v39 }
 0x9f5   :  { %584 = vrot.lane.b32.xlu0 %v583_v41, %s1425_s24  ;;  %v576_v43 = vpop.permute.xlu2 %575 }
 0xa67   :  { %v585_v45 = vpop.permute.xlu0 %584 }
 0xa68   :  { %v587_v46 = vmul.f32 %v585_v45, %v576_v43 }
 0xa6a   :  { %v595_v47 = vadd.f32 %v594_v44, %v587_v46 }
 0xa6c   :  { %597 = vst.msk [vmem:[#allocation2] sm:$0x3] %vm83_vm0, %v595_v47 }
 0xa6d PF:  { %s1163_s25 = sld [smem:[#allocation6 + $0x4]] }
 0xa73   :  { %p1164_p10 = scmp.eq.s32.totalorder %s1163_s25, 0 }
 0xa74   :  { %s1427_s26 = smov (!%p1164_p10), 64   ;;  %s1428_s27 = smov (!%p1164_p10), 32  }
 0xa75   :  { %603 = sbr.rel (%p1164_p10) target bundleno = 3286 (0xcd6), region = 69  ;;  %s1429_s28 = smov (!%p1164_p10), 96  }
 0xa7a   :  { %623 = vmatpush.msra.mxu0 %v1551_v11  ;;  %v1644_v48 = vld [vmem:[#allocation2] sm:$0x3]  ;;  %v606_v49 = vperm.slane %v1556_v12, 0  ;;  %v705_v20 = vsub.f32 1.0, %v1543_v7  ;;  %v1430_v21 = vmov 4   ;;  %vm699_vm6 = vcmask 1041409  }
 0xa7b   :  { %v678_v54 = vrot.slane %v1644_v48, 4  ;;  %v679_v5 = vrot.slane %v1644_v48, 5  ;;  %1265 = vset.pattern.permute.xlu1 %v1430_v21  ;;  %1264 = vset.pattern.permute.xlu2 %v1430_v21 }
 0xa7c   :  { %624 = vmatpush.msra.mxu0 %v1549_v10  ;;  %1266 = vset.pattern.permute.xlu0 %v1430_v21 }
 0xa7e   :  { %625 = vmatpush.msra.mxu0 %v1547_v9 }
 0xa80   :  { %626 = vmatpush.msra.mxu0 %v1545_v8 }
 0xa81   :  { %1165 = vmatmul.msk.f32.vlgmr.msra.gmra.mxu0 %vm100_vm1, %v1644_v48 }
 0xafe   :  { %v628_v50 = vpop.f32.mrf.mxu0 }
 0xaff   :  { %v629_v51 = vadd.f32 %v628_v50, %v606_v49 }
 0xb01   :  { %v632_v52 = vrot.slane %v629_v51, 4  ;;  %v633_v53 = vrot.slane %v629_v51, 5 }
 0xb03   :  { %646 = vrot.lane.b32.xlu0 %v632_v52, %s1427_s26  ;;  %v636_v55 = vadd.f32 %v632_v52, %v1561_v16  ;;  %v637_v57 = vadd.f32 %v633_v53, %v1563_v17 }
 0xb05   :  { %v638_v56 = vmul.f32 0.5, %v636_v55  ;;  %v639_v58 = vmul.f32 0.5, %v637_v57 }
 0xb07   :  { %1267 = vtanh.f32 %v638_v56 }
 0xb08   :  { %1269 = vtanh.f32 %v639_v58 }
 0xb0b   :  { %648 = vrot.lane.b32.xlu0 %v633_v53, %s1427_s26 }
 0xb0d   :  { %v1268_v59 = vpop.eup %1267 }
 0xb0e   :  { %v642_v60 = vadd.f32 1.0, %v1268_v59  ;;  %v1270_v62 = vpop.eup %1269 }
 0xb0f   :  { %v643_v1 = vadd.f32 1.0, %v1270_v62 }
 0xb10   :  { %v644_v61 = vmul.f32 0.5, %v642_v60 }
 0xb11   :  { %v645_v2 = vmul.f32 0.5, %v643_v1 }
 0xb12   :  { %v666_v23 = vsub.f32 1.0, %v644_v61 }
 0xb13   :  { %680 = vrot.lane.b32.xlu0 %v678_v54, %s1428_s27  ;;  %v667_v28 = vsub.f32 1.0, %v645_v2 }
 0xb75   :  { %v647_v63 = vpop.permute.xlu0 %646 }
 0xb76   :  { %v652_v0 = vmul.f32 %v647_v63, %v644_v61 }
 0xb78   :  { %656 = vrot.lane.b32.xlu1 %v652_v0, %s1427_s26 }
 0xb7d   :  { %v649_v3 = vpop.permute.xlu0 %648 }
 0xb7e   :  { %v653_v4 = vmul.f32 %v649_v3, %v645_v2 }
 0xb80   :  { %658 = vrot.lane.b32.xlu1 %v653_v4, %s1427_s26 }
 0xb85   :  { %v681_v24 = vpop.permute.xlu0 %680 }
 0xb86   :  { %v686_v27 = vmul.f32 %v681_v24, %v644_v61 }
 0xb88   :  { %682 = vrot.lane.b32.xlu1 %v679_v5, %s1428_s27 }
 0xb90   :  { %708 = vperm.xlu1 %1265, %v705_v20  }
 0xbea   :  { %v657_v6 = vpop.permute.xlu1 %656 }
 0xbeb   :  { %v662_v13 = vadd.f32 %v657_v6, %v1561_v16 }
 0xbed   :  { %1271 = vtanh.f32 %v662_v13 }
 0xbf2   :  { %v659_v14 = vpop.permute.xlu1 %658 }
 0xbf3   :  { %v1272_v15 = vpop.eup %1271  ;;  %v663_v18 = vadd.f32 %v659_v14, %v1563_v17 }
 0xbf4   :  { %670 = vrot.lane.b32.xlu2 %v1272_v15, %s1429_s28 }
 0xbf5   :  { %1273 = vtanh.f32 %v663_v18 }
 0xbfa   :  { %v683_v26 = vpop.permute.xlu1 %682 }
 0xbfb   :  { %v1274_v19 = vpop.eup %1273  ;;  %v687_v30 = vmul.f32 %v683_v26, %v645_v2 }
 0xbfc   :  { %672 = vrot.lane.b32.xlu2 %v1274_v19, %s1429_s28 }
 0xc02   :  { %v709_v37 = vpop.permute.xlu1 %708 }
 0xc03   :  { %v711_v39 = vmul.f32 %v709_v37, %v1644_v48 }
 0xc04   :  { %692 = vperm.xlu2 %1264, %v1543_v7  }
 0xc4e   :  { %v671_v22 = vpop.permute.xlu2 %670 }
 0xc4f   :  { %v676_v25 = vmul.f32 %v671_v22, %v666_v23 }
 0xc51   :  { %v688_v31 = vadd.f32 %v686_v27, %v676_v25 }
 0xc53   :  { %v697_v34 = vrot.slane %v688_v31, 4 }
 0xc56   :  { %v673_v29 = vpop.permute.xlu2 %672 }
 0xc57   :  { %v677_v32 = vmul.f32 %v673_v29, %v667_v28 }
 0xc59   :  { %v689_v33 = vadd.f32 %v687_v30, %v677_v32 }
 0xc5b   :  { %v698_v35 = vrot.slane %v689_v33, 3 }
 0xc5d   :  { %v700_v36 = vsel %vm699_vm6, %v698_v35, %v697_v34 }
 0xc5e   :  { %701 = vrot.lane.b32.xlu0 %v700_v36, %s1429_s28  ;;  %v693_v38 = vpop.permute.xlu2 %692 }
 0xcd0   :  { %v702_v40 = vpop.permute.xlu0 %701 }
 0xcd1   :  { %v704_v41 = vmul.f32 %v702_v40, %v693_v38 }
 0xcd3   :  { %v712_v42 = vadd.f32 %v711_v39, %v704_v41 }
 0xcd5   :  { %714 = vst.msk [vmem:[#allocation2] sm:$0x3] %vm83_vm0, %v712_v42 }
 0xcd6 PF:  { %s1166_s2 = sld [smem:[#allocation6 + $0x5]] }
 0xcdc   :  { %p1167_p11 = scmp.eq.s32.totalorder %s1166_s2, 0 }
 0xcdd   :  { %s1431_s29 = smov (!%p1167_p11), 64   ;;  %s1432_s0 = smov (!%p1167_p11), 32  }
 0xcde   :  { %720 = sbr.rel (%p1167_p11) target bundleno = 3903 (0xf3f), region = 73  ;;  %s1433_s30 = smov (!%p1167_p11), 96  }
 0xce3   :  { %740 = vmatpush.msra.mxu0 %v1551_v11  ;;  %v1663_v43 = vld [vmem:[#allocation2] sm:$0x3]  ;;  %v723_v44 = vperm.slane %v1556_v12, 0  ;;  %v822_v13 = vsub.f32 1.0, %v1543_v7  ;;  %v1434_v14 = vmov 5   ;;  %vm816_vm7 = vcmask 1041409  }
 0xce4   :  { %v795_v49 = vrot.slane %v1663_v43, 3  ;;  %v796_v0 = vrot.slane %v1663_v43, 4  ;;  %1276 = vset.pattern.permute.xlu1 %v1434_v14  ;;  %1275 = vset.pattern.permute.xlu2 %v1434_v14 }
 0xce5   :  { %741 = vmatpush.msra.mxu0 %v1549_v10  ;;  %1277 = vset.pattern.permute.xlu0 %v1434_v14 }
 0xce7   :  { %742 = vmatpush.msra.mxu0 %v1547_v9 }
 0xce9   :  { %743 = vmatpush.msra.mxu0 %v1545_v8 }
 0xcea   :  { %1168 = vmatmul.msk.f32.vlgmr.msra.gmra.mxu0 %vm100_vm1, %v1663_v43 }
 0xd67   :  { %v745_v45 = vpop.f32.mrf.mxu0 }
 0xd68   :  { %v746_v46 = vadd.f32 %v745_v45, %v723_v44 }
 0xd6a   :  { %v749_v47 = vrot.slane %v746_v46, 3  ;;  %v750_v48 = vrot.slane %v746_v46, 4 }
 0xd6c   :  { %763 = vrot.lane.b32.xlu0 %v749_v47, %s1431_s29  ;;  %v753_v50 = vadd.f32 %v749_v47, %v1561_v16  ;;  %v754_v52 = vadd.f32 %v750_v48, %v1563_v17 }
 0xd6e   :  { %v755_v51 = vmul.f32 0.5, %v753_v50  ;;  %v756_v53 = vmul.f32 0.5, %v754_v52 }
 0xd70   :  { %1278 = vtanh.f32 %v755_v51 }
 0xd71   :  { %1280 = vtanh.f32 %v756_v53 }
 0xd74   :  { %765 = vrot.lane.b32.xlu0 %v750_v48, %s1431_s29 }
 0xd76   :  { %v1279_v54 = vpop.eup %1278 }
 0xd77   :  { %v759_v55 = vadd.f32 1.0, %v1279_v54  ;;  %v1281_v57 = vpop.eup %1280 }
 0xd78   :  { %v760_v60 = vadd.f32 1.0, %v1281_v57 }
 0xd79   :  { %v761_v56 = vmul.f32 0.5, %v759_v55 }
 0xd7a   :  { %v762_v61 = vmul.f32 0.5, %v760_v60 }
 0xd7b   :  { %v783_v18 = vsub.f32 1.0, %v761_v56 }
 0xd7c   :  { %797 = vrot.lane.b32.xlu0 %v795_v49, %s1432_s0  ;;  %v784_v23 = vsub.f32 1.0, %v762_v61 }
 0xdde   :  { %v764_v58 = vpop.permute.xlu0 %763 }
 0xddf   :  { %v769_v59 = vmul.f32 %v764_v58, %v761_v56 }
 0xde1   :  { %773 = vrot.lane.b32.xlu1 %v769_v59, %s1431_s29 }
 0xde6   :  { %v766_v62 = vpop.permute.xlu0 %765 }
 0xde7   :  { %v770_v63 = vmul.f32 %v766_v62, %v762_v61 }
 0xde9   :  { %775 = vrot.lane.b32.xlu1 %v770_v63, %s1431_s29 }
 0xdee   :  { %v798_v19 = vpop.permute.xlu0 %797 }
 0xdef   :  { %v803_v22 = vmul.f32 %v798_v19, %v761_v56 }
 0xdf1   :  { %799 = vrot.lane.b32.xlu1 %v796_v0, %s1432_s0 }
 0xdf9   :  { %825 = vperm.xlu1 %1276, %v822_v13  }
 0xe53   :  { %v774_v1 = vpop.permute.xlu1 %773 }
 0xe54   :  { %v779_v2 = vadd.f32 %v774_v1, %v1561_v16 }
 0xe56   :  { %1282 = vtanh.f32 %v779_v2 }
 0xe5b   :  { %v776_v3 = vpop.permute.xlu1 %775 }
 0xe5c   :  { %v1283_v4 = vpop.eup %1282  ;;  %v780_v5 = vadd.f32 %v776_v3, %v1563_v17 }
 0xe5d   :  { %787 = vrot.lane.b32.xlu2 %v1283_v4, %s1433_s30 }
 0xe5e   :  { %1284 = vtanh.f32 %v780_v5 }
 0xe63   :  { %v800_v21 = vpop.permute.xlu1 %799 }
 0xe64   :  { %v1285_v6 = vpop.eup %1284  ;;  %v804_v25 = vmul.f32 %v800_v21, %v762_v61 }
 0xe65   :  { %789 = vrot.lane.b32.xlu2 %v1285_v6, %s1433_s30 }
 0xe6b   :  { %v826_v32 = vpop.permute.xlu1 %825 }
 0xe6c   :  { %v828_v34 = vmul.f32 %v826_v32, %v1663_v43 }
 0xe6d   :  { %809 = vperm.xlu2 %1275, %v1543_v7  }
 0xeb7   :  { %v788_v15 = vpop.permute.xlu2 %787 }
 0xeb8   :  { %v793_v20 = vmul.f32 %v788_v15, %v783_v18 }
 0xeba   :  { %v805_v26 = vadd.f32 %v803_v22, %v793_v20 }
 0xebc   :  { %v814_v29 = vrot.slane %v805_v26, 5 }
 0xebf   :  { %v790_v24 = vpop.permute.xlu2 %789 }
 0xec0   :  { %v794_v27 = vmul.f32 %v790_v24, %v784_v23 }
 0xec2   :  { %v806_v28 = vadd.f32 %v804_v25, %v794_v27 }
 0xec4   :  { %v815_v30 = vrot.slane %v806_v28, 4 }
 0xec6   :  { %v817_v31 = vsel %vm816_vm7, %v815_v30, %v814_v29 }
 0xec7   :  { %818 = vrot.lane.b32.xlu0 %v817_v31, %s1433_s30  ;;  %v810_v33 = vpop.permute.xlu2 %809 }
 0xf39   :  { %v819_v35 = vpop.permute.xlu0 %818 }
 0xf3a   :  { %v821_v36 = vmul.f32 %v819_v35, %v810_v33 }
 0xf3c   :  { %v829_v37 = vadd.f32 %v828_v34, %v821_v36 }
 0xf3e   :  { %831 = vst.msk [vmem:[#allocation2] sm:$0x3] %vm83_vm0, %v829_v37 }
 0xf3f PF:  { %s1169_s12 = sld [smem:[#allocation6 + $0x6]] }
 0xf45   :  { %p1170_p12 = scmp.eq.s32.totalorder %s1169_s12, 0 }
 0xf46   :  { %s1435_s5 = smov (!%p1170_p12), 64   ;;  %s1436_s13 = smov (!%p1170_p12), 32  }
 0xf47   :  { %837 = sbr.rel (%p1170_p12) target bundleno = 4520 (0x11a8), region = 77  ;;  %s1437_s14 = smov (!%p1170_p12), 96  }
 0xf4c   :  { %857 = vmatpush.msra.mxu0 %v1551_v11  ;;  %v1682_v38 = vld [vmem:[#allocation2] sm:$0x3]  ;;  %v840_v39 = vperm.slane %v1556_v12, 0  ;;  %v939_v2 = vsub.f32 1.0, %v1543_v7  ;;  %v1438_v3 = vmov 6   ;;  %vm933_vm8 = vcmask 1041409  }
 0xf4d   :  { %v912_v44 = vrot.slane %v1682_v38, 2  ;;  %v913_v59 = vrot.slane %v1682_v38, 3  ;;  %1287 = vset.pattern.permute.xlu1 %v1438_v3  ;;  %1286 = vset.pattern.permute.xlu2 %v1438_v3 }
 0xf4e   :  { %858 = vmatpush.msra.mxu0 %v1549_v10  ;;  %1288 = vset.pattern.permute.xlu0 %v1438_v3 }
 0xf50   :  { %859 = vmatpush.msra.mxu0 %v1547_v9 }
 0xf52   :  { %860 = vmatpush.msra.mxu0 %v1545_v8 }
 0xf53   :  { %1171 = vmatmul.msk.f32.vlgmr.msra.gmra.mxu0 %vm100_vm1, %v1682_v38 }
 0xfd0   :  { %v862_v40 = vpop.f32.mrf.mxu0 }
 0xfd1   :  { %v863_v41 = vadd.f32 %v862_v40, %v840_v39 }
 0xfd3   :  { %v866_v42 = vrot.slane %v863_v41, 2  ;;  %v867_v43 = vrot.slane %v863_v41, 3 }
 0xfd5   :  { %880 = vrot.lane.b32.xlu0 %v866_v42, %s1435_s5  ;;  %v870_v45 = vadd.f32 %v866_v42, %v1561_v16  ;;  %v871_v47 = vadd.f32 %v867_v43, %v1563_v17 }
 0xfd7   :  { %v872_v46 = vmul.f32 0.5, %v870_v45  ;;  %v873_v48 = vmul.f32 0.5, %v871_v47 }
 0xfd9   :  { %1289 = vtanh.f32 %v872_v46 }
 0xfda   :  { %1291 = vtanh.f32 %v873_v48 }
 0xfdd   :  { %882 = vrot.lane.b32.xlu0 %v867_v43, %s1435_s5 }
 0xfdf   :  { %v1290_v49 = vpop.eup %1289 }
 0xfe0   :  { %v876_v50 = vadd.f32 1.0, %v1290_v49  ;;  %v1292_v52 = vpop.eup %1291 }
 0xfe1   :  { %v877_v55 = vadd.f32 1.0, %v1292_v52 }
 0xfe2   :  { %v878_v51 = vmul.f32 0.5, %v876_v50 }
 0xfe3   :  { %v879_v56 = vmul.f32 0.5, %v877_v55 }
 0xfe4   :  { %v900_v5 = vsub.f32 1.0, %v878_v51 }
 0xfe5   :  { %914 = vrot.lane.b32.xlu0 %v912_v44, %s1436_s13  ;;  %v901_v18 = vsub.f32 1.0, %v879_v56 }
0x1047   :  { %v881_v53 = vpop.permute.xlu0 %880 }
0x1048   :  { %v886_v54 = vmul.f32 %v881_v53, %v878_v51 }
0x104a   :  { %890 = vrot.lane.b32.xlu1 %v886_v54, %s1435_s5 }
0x104f   :  { %v883_v57 = vpop.permute.xlu0 %882 }
0x1050   :  { %v887_v58 = vmul.f32 %v883_v57, %v879_v56 }
0x1052   :  { %892 = vrot.lane.b32.xlu1 %v887_v58, %s1435_s5 }
0x1057   :  { %v915_v6 = vpop.permute.xlu0 %914 }
0x1058   :  { %v920_v15 = vmul.f32 %v915_v6, %v878_v51 }
0x105a   :  { %916 = vrot.lane.b32.xlu1 %v913_v59, %s1436_s13 }
0x1062   :  { %942 = vperm.xlu1 %1287, %v939_v2  }
0x10bc   :  { %v891_v60 = vpop.permute.xlu1 %890 }
0x10bd   :  { %v896_v61 = vadd.f32 %v891_v60, %v1561_v16 }
0x10bf   :  { %1293 = vtanh.f32 %v896_v61 }
0x10c4   :  { %v893_v62 = vpop.permute.xlu1 %892 }
0x10c5   :  { %v1294_v63 = vpop.eup %1293  ;;  %v897_v0 = vadd.f32 %v893_v62, %v1563_v17 }
0x10c6   :  { %904 = vrot.lane.b32.xlu2 %v1294_v63, %s1437_s14 }
0x10c7   :  { %1295 = vtanh.f32 %v897_v0 }
0x10cc   :  { %v917_v14 = vpop.permute.xlu1 %916 }
0x10cd   :  { %v1296_v1 = vpop.eup %1295  ;;  %v921_v20 = vmul.f32 %v917_v14, %v879_v56 }
0x10ce   :  { %906 = vrot.lane.b32.xlu2 %v1296_v1, %s1437_s14 }
0x10d4   :  { %v943_v27 = vpop.permute.xlu1 %942 }
0x10d5   :  { %v945_v29 = vmul.f32 %v943_v27, %v1682_v38 }
0x10d6   :  { %926 = vperm.xlu2 %1286, %v1543_v7  }
0x1120   :  { %v905_v4 = vpop.permute.xlu2 %904 }
0x1121   :  { %v910_v13 = vmul.f32 %v905_v4, %v900_v5 }
0x1123   :  { %v922_v21 = vadd.f32 %v920_v15, %v910_v13 }
0x1125   :  { %v931_v24 = vrot.slane %v922_v21, 6 }
0x1128   :  { %v907_v19 = vpop.permute.xlu2 %906 }
0x1129   :  { %v911_v22 = vmul.f32 %v907_v19, %v901_v18 }
0x112b   :  { %v923_v23 = vadd.f32 %v921_v20, %v911_v22 }
0x112d   :  { %v932_v25 = vrot.slane %v923_v23, 5 }
0x112f   :  { %v934_v26 = vsel %vm933_vm8, %v932_v25, %v931_v24 }
0x1130   :  { %935 = vrot.lane.b32.xlu0 %v934_v26, %s1437_s14  ;;  %v927_v28 = vpop.permute.xlu2 %926 }
0x11a2   :  { %v936_v30 = vpop.permute.xlu0 %935 }
0x11a3   :  { %v938_v31 = vmul.f32 %v936_v30, %v927_v28 }
0x11a5   :  { %v946_v32 = vadd.f32 %v945_v29, %v938_v31 }
0x11a7   :  { %948 = vst.msk [vmem:[#allocation2] sm:$0x3] %vm83_vm0, %v946_v32 }
0x11a8 PF:  { %s1172_s15 = sld [smem:[#allocation6 + $0x7]] }
0x11ae   :  { %p1173_p13 = scmp.eq.s32.totalorder %s1172_s15, 0 }
0x11af   :  { %s1439_s4 = smov (!%p1173_p13), 64   ;;  %s1440_s7 = smov (!%p1173_p13), 32  }
0x11b0   :  { %954 = sbr.rel (%p1173_p13) target bundleno = 5137 (0x1411), region = 81  ;;  %s1441_s8 = smov (!%p1173_p13), 96  }
0x11b5   :  { %974 = vmatpush.msra.mxu0 %v1551_v11  ;;  %v1701_v33 = vld [vmem:[#allocation2] sm:$0x3]  ;;  %v957_v34 = vperm.slane %v1556_v12, 0  ;;  %v1056_v56 = vsub.f32 1.0, %v1543_v7  ;;  %v1442_v57 = vmov 7   ;;  %vm1050_vm9 = vcmask 1041409  }
0x11b6   :  { %v1030_v49 = vrot.slane %v1701_v33, 2  ;;  %1298 = vset.pattern.permute.xlu1 %v1442_v57  ;;  %1297 = vset.pattern.permute.xlu2 %v1442_v57 }
0x11b7   :  { %975 = vmatpush.msra.mxu0 %v1549_v10  ;;  %v1029_v10 = vrot.slane %v1701_v33, 1  ;;  %1299 = vset.pattern.permute.xlu0 %v1442_v57 }
0x11b9   :  { %976 = vmatpush.msra.mxu0 %v1547_v9 }
0x11bb   :  { %977 = vmatpush.msra.mxu0 %v1545_v8 }
0x11bc   :  { %1174 = vmatmul.msk.f32.vlgmr.msra.gmra.mxu0 %vm100_vm1, %v1701_v33 }
0x1239   :  { %v979_v35 = vpop.f32.mrf.mxu0 }
0x123a   :  { %v980_v36 = vadd.f32 %v979_v35, %v957_v34 }
0x123c   :  { %v983_v37 = vrot.slane %v980_v36, 1  ;;  %v984_v38 = vrot.slane %v980_v36, 2 }
0x123e   :  { %997 = vrot.lane.b32.xlu0 %v983_v37, %s1439_s4  ;;  %v987_v9 = vadd.f32 %v983_v37, %v1561_v16  ;;  %v988_v8 = vadd.f32 %v984_v38, %v1563_v17 }
0x1240   :  { %v989_v11 = vmul.f32 0.5, %v987_v9  ;;  %v990_v39 = vmul.f32 0.5, %v988_v8 }
0x1242   :  { %1300 = vtanh.f32 %v989_v11 }
0x1243   :  { %1302 = vtanh.f32 %v990_v39 }
0x1246   :  { %999 = vrot.lane.b32.xlu0 %v984_v38, %s1439_s4 }
0x1248   :  { %v1301_v40 = vpop.eup %1300 }
0x1249   :  { %v993_v12 = vadd.f32 1.0, %v1301_v40  ;;  %v1303_v42 = vpop.eup %1302 }
0x124a   :  { %v994_v45 = vadd.f32 1.0, %v1303_v42 }
0x124b   :  { %v995_v41 = vmul.f32 0.5, %v993_v12 }
0x124c   :  { %v996_v46 = vmul.f32 0.5, %v994_v45 }
0x124d   :  { %v1017_v58 = vsub.f32 1.0, %v995_v41 }
0x124e   :  { %1031 = vrot.lane.b32.xlu0 %v1029_v10, %s1440_s7  ;;  %v1018_v62 = vsub.f32 1.0, %v996_v46 }
0x12b0   :  { %v998_v43 = vpop.permute.xlu0 %997 }
0x12b1   :  { %v1003_v44 = vmul.f32 %v998_v43, %v995_v41 }
0x12b3   :  { %1007 = vrot.lane.b32.xlu1 %v1003_v44, %s1439_s4 }
0x12b8   :  { %v1000_v47 = vpop.permute.xlu0 %999 }
0x12b9   :  { %v1004_v48 = vmul.f32 %v1000_v47, %v996_v46 }
0x12bb   :  { %1009 = vrot.lane.b32.xlu1 %v1004_v48, %s1439_s4 }
0x12c0   :  { %v1032_v59 = vpop.permute.xlu0 %1031 }
0x12c3   :  { %1033 = vrot.lane.b32.xlu1 %v1030_v49, %s1440_s7 }
0x12cb   :  { %1059 = vperm.xlu1 %1298, %v1056_v56  }
0x1325   :  { %v1008_v50 = vpop.permute.xlu1 %1007 }
0x1326   :  { %v1013_v51 = vadd.f32 %v1008_v50, %v1561_v16 }
0x1328   :  { %1304 = vtanh.f32 %v1013_v51 }
0x132d   :  { %v1010_v52 = vpop.permute.xlu1 %1009 }
0x132e   :  { %v1305_v53 = vpop.eup %1304  ;;  %v1014_v54 = vadd.f32 %v1010_v52, %v1563_v17  ;;  %v1037_v17 = vmul.f32 %v1032_v59, %v995_v41 }
0x132f   :  { %1021 = vrot.lane.b32.xlu2 %v1305_v53, %s1441_s8 }
0x1330   :  { %1306 = vtanh.f32 %v1014_v54 }
0x1335   :  { %v1034_v61 = vpop.permute.xlu1 %1033 }
0x1336   :  { %v1307_v55 = vpop.eup %1306  ;;  %v1038_v0 = vmul.f32 %v1034_v61, %v996_v46 }
0x1337   :  { %1023 = vrot.lane.b32.xlu2 %v1307_v55, %s1441_s8 }
0x133d   :  { %v1060_v13 = vpop.permute.xlu1 %1059 }
0x133e   :  { %v1062_v14 = vmul.f32 %v1060_v13, %v1701_v33 }
0x133f   :  { %1043 = vperm.xlu2 %1297, %v1543_v7  }
0x1389   :  { %v1022_v16 = vpop.permute.xlu2 %1021 }
0x138a   :  { %v1027_v60 = vmul.f32 %v1022_v16, %v1017_v58 }
0x138c   :  { %v1039_v1 = vadd.f32 %v1037_v17, %v1027_v60 }
0x138e   :  { %v1048_v4 = vrot.slane %v1039_v1, 7 }
0x1391   :  { %v1024_v63 = vpop.permute.xlu2 %1023 }
0x1392   :  { %v1028_v2 = vmul.f32 %v1024_v63, %v1018_v62 }
0x1394   :  { %v1040_v3 = vadd.f32 %v1038_v0, %v1028_v2 }
0x1396   :  { %v1049_v5 = vrot.slane %v1040_v3, 6 }
0x1398   :  { %v1051_v6 = vsel %vm1050_vm9, %v1049_v5, %v1048_v4 }
0x1399   :  { %1052 = vrot.lane.b32.xlu0 %v1051_v6, %s1441_s8  ;;  %v1044_v7 = vpop.permute.xlu2 %1043 }
0x140b   :  { %v1053_v15 = vpop.permute.xlu0 %1052 }
0x140c   :  { %v1055_v18 = vmul.f32 %v1053_v15, %v1044_v7 }
0x140e   :  { %v1063_v19 = vadd.f32 %v1062_v14, %v1055_v18 }
0x1410   :  { %1065 = vst.msk [vmem:[#allocation2] sm:$0x3] %vm83_vm0, %v1063_v19 }
0x1411 PF:  { %v1073_v20 = vld [vmem:[%s1747_s9 + $0x18] sm:$0xff]  ;;  %v1072_v21 = vld [vmem:[%s1747_s9 + $0x10] sm:$0xff]  ;;  %v1071_v22 = vld [vmem:[%s1747_s9 + $0x8] sm:$0xff]  ;;  %vm1078_vm10 = vcmask 261120   ;;  %vm1102_vm11 = vcmask 9216   ;;  %s1135_s25 = sshll.u32 %s1749_s11, 4  ;;  %s1136_s25 = int_to_ptr.hbm [resolvable:$true] %s1135_s25 }
0x1412   :  { %1094 = vmatpush.msra.mxu0 %v1073_v20  ;;  %v1070_v23 = vld [vmem:[%s1747_s9] sm:$0xff]  ;;  %s1443_s9 = smov [#allocation12]  }
0x1413   :  { %v1308_v25 = vld [vmem:[%s1748_s10] ss:$0 sm:$0xff]  ;;  %s1133_s10 = sshll.u32 %s1443_s9, 4  ;;  %s1134_s10 = int_to_ptr.vmem [resolvable:$true] %s1133_s10 }
0x1414   :  { %1095 = vmatpush.msra.mxu0 %v1072_v21 }
0x1416   :  { %1096 = vmatpush.msra.mxu0 %v1071_v22 }
0x1417   :  { %v1069_v24 = vld [vmem:[#allocation2] sm:$0x3] }
0x1418   :  { %1097 = vmatpush.msra.mxu0 %v1070_v23 }
0x1419   :  { %1175 = vmatmul.msk.f32.vlgmr.msra.gmra.mxu0 %vm1078_vm10, %v1069_v24 }
0x1496   :  { %v1099_v26 = vpop.f32.mrf.mxu0 }
0x1497   :  { %v1100_v27 = vadd.f32 %v1308_v25, %v1099_v26 }
0x1499   :  { %v1103_v28 = vsel %vm1102_vm11, %v1100_v27, -inf }
0x149a   :  { %1104 = vmax.xlane.f32.xlu0 %v1103_v28 }
0x150d   :  { %v1105_v29 = vpop.xlane.xlu0 %1104 }
0x150e   :  { %v1106_v30 = vsub.f32 %v1100_v27, %v1105_v29 }
0x1510   :  { %v1107_v31 = vmul.f32 1.442695, %v1106_v30 }
0x1512   :  { %1309 = vpow2.f32 %v1107_v31 }
0x1518   :  { %v1310_v32 = vpop.eup %1309 }
0x1519   :  { %v1109_v33 = vsel %vm1102_vm11, %v1310_v32, 0.0 }
0x151a   :  { %1110 = vadd.xlane.f32.xlu0 %v1109_v33 }
0x158d   :  { %v1111_v34 = vpop.xlane.xlu0 %1110 }
0x158e   :  { %1311 = vrcp.f32 %v1111_v34  ;;  %v1123_v38 = vand.u32 2147483648, %v1111_v34  ;;  %v1121_v9 = vand.u32 2147483647, %v1111_v34  ;;  %vm1117_vm13 = vweird.f32 %v1111_v34 }
0x1590   :  { %v1124_v8 = vor.u32 1.1754944e-38, %v1123_v38  ;;  %vm1122_vm15 = vcmp.eq.f32.partialorder %v1121_v9, 8.507059e+37 }
0x1594   :  { %v1312_v35 = vpop.eup %1311 }
0x1595   :  { %v1113_v36 = vmul.f32 %v1312_v35, %v1111_v34  ;;  %vm1118_vm12 = vweird.f32 %v1312_v35 }
0x1596   :  { %vm1119_vm14 = vmor %vm1117_vm13, %vm1118_vm12 }
0x1597   :  { %v1114_v37 = vsub.f32 1.0, %v1113_v36 }
0x1599   :  { %v1115_v10 = vmul.f32 %v1312_v35, %v1114_v37 }
0x159b   :  { %v1116_v11 = vadd.f32 %v1312_v35, %v1115_v10 }
0x159d   :  { %v1120_v39 = vsel %vm1119_vm14, %v1312_v35, %v1116_v11 }
0x159e   :  { %v1125_v40 = vsel %vm1122_vm15, %v1124_v8, %v1120_v39 }
0x159f   :  { %v1126_v12 = vmul.f32 %v1310_v32, %v1125_v40 }
0x15a1   :  { %1127 = vst.msk [vmem:[#allocation12] sm:$0x3] %vm1102_vm11, %v1126_v12 }
0x15a2   :  { %1138 = dma.vmem_to_hbm [thread:$0]  %s1134_s10, 32, %s1136_s25, [#allocation9]  }
0x15a3   :  { %1403 = dma.done.wait [#allocation9], 32  }
0x15a4   :  { %1404 = vsyncadd [#allocation9], 4294967264 }
0x15a5   :  { %1143 = vsyncpa [#allocation8], 1 }
0x15a6   :  { %1144 = vsyncpa [#allocation11], 1 }
0x15a7   :  { %1145 = vsyncpa [#allocation9], 1 }

</bundles_post_ra>
